<compile_context>
chip_gen: v7x
topology: tpu7x:2x2x1
jax: 0.10.0
libtpu: 0.0.40
codegen_flags: <defaults>
</compile_context>

<pallas_src>
import functools

import jax
import jax.numpy as jnp
from jax import lax
from jax.experimental import pallas as pl
from jax.experimental.pallas import tpu as pltpu


def _fused_lstm_kernel(x_hbm, wih_ref, whh_ref, b_ref, hlast_ref, clast_ref,
                       seq_sc, proj_sc, copy_sem, *, seq_len, in_dim, hidden):
    """One grid step == one LSTM layer; the full time recurrence runs inside."""
    l = pl.program_id(0)
    T = seq_len
    B = seq_sc.shape[1]
    D = in_dim          # padded per-layer input width (= max(E, H))
    H = hidden

    # Layer 0: DMA the embedded sequence straight from HBM into the resident
    # VMEM scratch (the only VMEM copy of the sequence). Later layers find the
    # previous layer's hidden states already in seq_sc[..., :H].
    @pl.when(l == 0)
    def _():
        cp = pltpu.make_async_copy(x_hbm, seq_sc, copy_sem)
        cp.start()
        cp.wait()

    w_ih = wih_ref[0]                    # (D, 4H) bf16; rows >= real width are 0
    w_hh = whh_ref[0]                    # (H, 4H) bf16
    b = b_ref[0]                         # (1, 4H) f32  (b_ih + b_hh)

    # Hoisted input projection: one large MXU pass for the whole sequence,
    # bias folded in once (outside the recurrence).
    src = seq_sc[...].reshape(T * B, D)                      # bf16
    proj = jnp.dot(src, w_ih, preferred_element_type=jnp.float32) + b
    proj_sc[...] = proj.reshape(T, B, 4 * H)

    def step(t, carry):
        h, c = carry                     # (B, H) f32 each
        gates = proj_sc[t] + jnp.dot(h.astype(jnp.bfloat16), w_hh,
                                     preferred_element_type=jnp.float32)
        # PyTorch gate order: i, f, g, o.
        i_g = jax.nn.sigmoid(gates[:, 0 * H:1 * H])
        f_g = jax.nn.sigmoid(gates[:, 1 * H:2 * H])
        g_g = jnp.tanh(gates[:, 2 * H:3 * H])
        o_g = jax.nn.sigmoid(gates[:, 3 * H:4 * H])
        c_new = f_g * c + i_g * g_g
        h_new = o_g * jnp.tanh(c_new)
        # Feed the next layer: write only the first H columns. Padded W_ih
        # rows [H, D) are zero for layers > 0, so stale columns are harmless.
        h_store = h_new.astype(seq_sc.dtype)
        if D > H:
            seq_sc[t, :, :H] = h_store
        else:
            seq_sc[t] = h_store
        return h_new, c_new

    h0 = jnp.zeros((B, H), jnp.float32)
    c0 = jnp.zeros((B, H), jnp.float32)
    # Small fixed T -> full unroll is fine; use partial unroll for large T.
    h_T, c_T = lax.fori_loop(0, T, step, (h0, c0), unroll=True)

    hlast_ref[0] = h_T
    clast_ref[0] = c_T


def encoder_lstm_forward(tokens, emb, layers):
    """tokens: [T, B] int32  ->  (h_n, c_n), each [num_layers, B, H] float32."""
    # Embedding lookup (gather) is glue in plain JAX.
    x = jnp.take(emb, tokens, axis=0)                    # [T, B, E] f32
    # TODO(synk): dropout (on the embedding and between LSTM layers) is the
    # eval-mode identity here; training-mode dropout would need a PRNG mask.
    T, B, E = x.shape
    H = layers[0][1].shape[0]
    L = len(layers)
    D = max(E, H)                                        # per-layer input width

    if E < D:
        x = jnp.pad(x, ((0, 0), (0, 0), (0, D - E)))
    x = x.astype(jnp.bfloat16)                           # halve HBM DMA / scratch

    # Per-layer weights: W_ih padded to D rows (rows >= real width MUST stay
    # zero -- the kernel relies on it), W_hh separate for the recurrent matmul.
    w_ih_all, w_hh_all, b_all = [], [], []
    for li, (w_ih, w_hh, b) in enumerate(layers):
        assert w_ih.shape[0] == (E if li == 0 else H), "unexpected W_ih width"
        w = jnp.zeros((D, 4 * H), jnp.float32)
        w = w.at[:w_ih.shape[0], :].set(w_ih)            # rows [width, D) stay 0
        w_ih_all.append(w)
        w_hh_all.append(w_hh)
        b_all.append(b.reshape(1, 4 * H))
    w_ih_all = jnp.stack(w_ih_all).astype(jnp.bfloat16)  # (L, D, 4H) bf16
    w_hh_all = jnp.stack(w_hh_all).astype(jnp.bfloat16)  # (L, H, 4H) bf16
    b_all = jnp.stack(b_all)                             # (L, 1, 4H) f32

    kernel = functools.partial(
        _fused_lstm_kernel, seq_len=T, in_dim=D, hidden=H)

    h_n, c_n = pl.pallas_call(
        kernel,
        out_shape=(jax.ShapeDtypeStruct((L, B, H), jnp.float32),
                   jax.ShapeDtypeStruct((L, B, H), jnp.float32)),
        grid_spec=pltpu.PrefetchScalarGridSpec(
            num_scalar_prefetch=0,
            grid=(L,),
            in_specs=[
                pl.BlockSpec(memory_space=pl.ANY),                      # x (HBM)
                pl.BlockSpec((1, D, 4 * H), lambda l: (l, 0, 0)),       # W_ih[l]
                pl.BlockSpec((1, H, 4 * H), lambda l: (l, 0, 0)),       # W_hh[l]
                pl.BlockSpec((1, 1, 4 * H), lambda l: (l, 0, 0)),       # bias[l]
            ],
            out_specs=[
                pl.BlockSpec((1, B, H), lambda l: (l, 0, 0)),           # h_n[l]
                pl.BlockSpec((1, B, H), lambda l: (l, 0, 0)),           # c_n[l]
            ],
            scratch_shapes=[
                pltpu.VMEM((T, B, D), jnp.bfloat16),       # seq / inter-layer acts
                pltpu.VMEM((T, B, 4 * H), jnp.float32),    # hoisted x-projection
                pltpu.SemaphoreType.DMA,                   # layer-0 seq DMA
            ]),
        compiler_params=pltpu.CompilerParams(
            # Layers are sequential (data dependency through the VMEM scratch).
            dimension_semantics=("arbitrary",),
            # Explicit scoped-VMEM budget; re-derive for production shapes
            # (v7x has only 64 MiB physical VMEM per TensorCore).
            vmem_limit_bytes=32 * 1024 * 1024),
    )(x, w_ih_all, w_hh_all, b_all)
    return h_n, c_n


def init_params(key, input_size, embedding_size, hidden_size, num_layers):
    """Deterministic synthetic parameters (shapes match nn.Embedding + nn.LSTM)."""
    keys = jax.random.split(key, 1 + 4 * num_layers)
    emb = jax.random.normal(keys[0], (input_size, embedding_size), jnp.float32) * 0.1
    layers = []
    for l in range(num_layers):
        in_dim = embedding_size if l == 0 else hidden_size
        k = keys[1 + 4 * l: 1 + 4 * (l + 1)]
        # torch stores W_ih as [4H, in_dim]; we keep the transposed [in_dim, 4H].
        w_ih = jax.random.normal(k[0], (in_dim, 4 * hidden_size), jnp.float32) * 0.1
        w_hh = jax.random.normal(k[1], (hidden_size, 4 * hidden_size), jnp.float32) * 0.1
        b_ih = jax.random.normal(k[2], (4 * hidden_size,), jnp.float32) * 0.1
        b_hh = jax.random.normal(k[3], (4 * hidden_size,), jnp.float32) * 0.1
        layers.append((w_ih, w_hh, b_ih + b_hh))
    return emb, layers


def _reference_forward(tokens, emb, layers):
    """Pure-JAX f32 reference for the sanity check."""
    x = jnp.take(emb, tokens, axis=0)
    h_list, c_list = [], []
    for (w_ih, w_hh, b) in layers:
        T, B, _ = x.shape
        H = w_hh.shape[0]

        def step(carry, x_t):
            h, c = carry
            gates = x_t @ w_ih + h @ w_hh + b
            i = jax.nn.sigmoid(gates[:, 0 * H:1 * H])
            f = jax.nn.sigmoid(gates[:, 1 * H:2 * H])
            g = jnp.tanh(gates[:, 2 * H:3 * H])
            o = jax.nn.sigmoid(gates[:, 3 * H:4 * H])
            c_new = f * c + i * g
            h_new = o * jnp.tanh(c_new)
            return (h_new, c_new), h_new

        (h_T, c_T), all_h = jax.lax.scan(
            step, (jnp.zeros((B, H)), jnp.zeros((B, H))), x)
        h_list.append(h_T)
        c_list.append(c_T)
        x = all_h
    return jnp.stack(h_list, axis=0), jnp.stack(c_list, axis=0)


if __name__ == "__main__":
    # Small shapes consistent with the module's forward.
    input_size = 50        # vocab
    embedding_size = 32
    hidden_size = 32
    num_layers = 2
    p = 0.0                # dropout prob (identity in eval mode)
    T, B = 8, 8            # seq_len, batch

    key = jax.random.PRNGKey(0)
    k_tok, k_par = jax.random.split(key)
    tokens = jax.random.randint(k_tok, (T, B), 0, input_size, dtype=jnp.int32)
    emb, layers = init_params(k_par, input_size, embedding_size, hidden_size,
                              num_layers)

    h_n, c_n = encoder_lstm_forward(tokens, emb, layers)
    h_n, c_n = jax.block_until_ready(h_n), jax.block_until_ready(c_n)

    # Numerical sanity check vs pure-JAX f32 reference (tolerance loosened for
    # the bf16 MXU inputs / bf16 inter-layer activations; accumulation and
    # state math remain f32).
    h_ref, c_ref = _reference_forward(tokens, emb, layers)
    assert h_n.shape == (num_layers, B, hidden_size)
    assert c_n.shape == (num_layers, B, hidden_size)
    assert jnp.allclose(h_n, h_ref, atol=2e-2), "hidden state mismatch"
    assert jnp.allclose(c_n, c_ref, atol=2e-2), "cell state mismatch"

    print("KERNEL_OK")
</pallas_src>

<mosaic_0001>
module attributes {stable_mosaic.version = 11 : i64} {
  func.func @_fused_lstm_kernel(%arg0: i32, %arg1: memref<8x8x32xbf16, #tpu.memory_space<any>>, %arg2: memref<1x32x128xbf16, #tpu.memory_space<vmem>>, %arg3: memref<1x32x128xbf16, #tpu.memory_space<vmem>>, %arg4: memref<1x1x128xf32, #tpu.memory_space<vmem>>, %arg5: memref<1x8x32xf32, #tpu.memory_space<vmem>>, %arg6: memref<1x8x32xf32, #tpu.memory_space<vmem>>, %arg7: memref<8x8x32xbf16, #tpu.memory_space<vmem>>, %arg8: memref<8x8x128xf32, #tpu.memory_space<vmem>>, %arg9: memref<!tpu.dma_semaphore, #tpu.memory_space<semaphore_mem>>) attributes {dimension_semantics = [#tpu.dimension_semantics<arbitrary>], iteration_bounds = array<i64: 2>, scalar_prefetch = 0 : i64, scratch_operands = 3 : i64, tpu.core_type = #tpu.core_type<tc>, window_params = [{}, {transform_indices = @transform_1, window_bounds = array<i64: 1, 32, 128>}, {transform_indices = @transform_2, window_bounds = array<i64: 1, 32, 128>}, {transform_indices = @transform_3, window_bounds = array<i64: 1, 1, 128>}, {transform_indices = @transform_4, window_bounds = array<i64: 1, 8, 32>}, {transform_indices = @transform_5, window_bounds = array<i64: 1, 8, 32>}]} {
    %c0_i32 = arith.constant 0 : i32
    %0 = arith.cmpi eq, %arg0, %c0_i32 : i32
    %1 = arith.extui %0 : i1 to i32
    %c0_i32_0 = arith.constant 0 : i32
    %2 = arith.cmpi ne, %1, %c0_i32_0 : i32
    scf.if %2 {
      tpu.enqueue_dma source(%arg1 : memref<8x8x32xbf16, #tpu.memory_space<any>>) target(%arg7 : memref<8x8x32xbf16, #tpu.memory_space<vmem>>) target_semaphore(%arg9 : memref<!tpu.dma_semaphore, #tpu.memory_space<semaphore_mem>>)
      tpu.wait_dma2 semaphore(%arg9 : memref<!tpu.dma_semaphore, #tpu.memory_space<semaphore_mem>>) src(%arg1 : memref<8x8x32xbf16, #tpu.memory_space<any>>) dst(%arg7 : memref<8x8x32xbf16, #tpu.memory_space<vmem>>)
    } else {
    }
    %c0 = arith.constant 0 : index
    %c0_1 = arith.constant 0 : index
    %c0_2 = arith.constant 0 : index
    %3 = vector.load %arg2[%c0, %c0_1, %c0_2] : memref<1x32x128xbf16, #tpu.memory_space<vmem>>, vector<1x32x128xbf16>
    %4 = vector.shape_cast %3 : vector<1x32x128xbf16> to vector<32x128xbf16>
    %c0_3 = arith.constant 0 : index
    %c0_4 = arith.constant 0 : index
    %c0_5 = arith.constant 0 : index
    %5 = vector.load %arg3[%c0_3, %c0_4, %c0_5] : memref<1x32x128xbf16, #tpu.memory_space<vmem>>, vector<1x32x128xbf16>
    %6 = vector.shape_cast %5 : vector<1x32x128xbf16> to vector<32x128xbf16>
    %c0_6 = arith.constant 0 : index
    %c0_7 = arith.constant 0 : index
    %c0_8 = arith.constant 0 : index
    %7 = vector.load %arg4[%c0_6, %c0_7, %c0_8] : memref<1x1x128xf32, #tpu.memory_space<vmem>>, vector<1x1x128xf32>
    %8 = vector.shape_cast %7 : vector<1x1x128xf32> to vector<1x128xf32>
    %c0_9 = arith.constant 0 : index
    %c0_10 = arith.constant 0 : index
    %c0_11 = arith.constant 0 : index
    %9 = vector.load %arg7[%c0_9, %c0_10, %c0_11] : memref<8x8x32xbf16, #tpu.memory_space<vmem>>, vector<8x8x32xbf16>
    %10 = vector.shape_cast %9 : vector<8x8x32xbf16> to vector<64x32xbf16>
    %cst = arith.constant dense<0.000000e+00> : vector<64x128xf32>
    %11 = tpu.matmul %10, %4, %cst {dimension_numbers = #tpu.dot_dimension_numbers<[1], [0], [0], [1], [0, 0, 1, 1], [], []>} : vector<64x32xbf16>, vector<32x128xbf16>, vector<64x128xf32> -> vector<64x128xf32>
    %12 = vector.broadcast %8 : vector<1x128xf32> to vector<64x128xf32>
    %13 = arith.addf %11, %12 : vector<64x128xf32>
    %14 = vector.shape_cast %13 : vector<64x128xf32> to vector<8x8x128xf32>
    %c0_12 = arith.constant 0 : index
    %c0_13 = arith.constant 0 : index
    %c0_14 = arith.constant 0 : index
    %15 = vector.load %arg8[%c0_12, %c0_13, %c0_14] : memref<8x8x128xf32, #tpu.memory_space<vmem>>, vector<8x8x128xf32>
    tpu.vector_store %arg8[%c0_12, %c0_13, %c0_14], %14 {strides = array<i32>} : memref<8x8x128xf32, #tpu.memory_space<vmem>>, vector<8x8x128xf32>,
    %cst_15 = arith.constant 0.000000e+00 : f32
    %16 = vector.broadcast %cst_15 : f32 to vector<8x32xf32>
    %cst_16 = arith.constant 0.000000e+00 : f32
    %17 = vector.broadcast %cst_16 : f32 to vector<8x32xf32>
    %c0_i32_17 = arith.constant 0 : i32
    %18 = arith.index_cast %c0_i32_17 : i32 to index
    %c0_18 = arith.constant 0 : index
    %c0_19 = arith.constant 0 : index
    %19 = vector.load %arg8[%18, %c0_18, %c0_19] : memref<8x8x128xf32, #tpu.memory_space<vmem>>, vector<1x8x128xf32>
    %20 = vector.shape_cast %19 : vector<1x8x128xf32> to vector<8x128xf32>
    %21 = arith.truncf %16 : vector<8x32xf32> to vector<8x32xbf16>
    %cst_20 = arith.constant dense<0.000000e+00> : vector<8x128xf32>
    %22 = tpu.matmul %21, %6, %cst_20 {dimension_numbers = #tpu.dot_dimension_numbers<[1], [0], [0], [1], [0, 0, 1, 1], [], []>} : vector<8x32xbf16>, vector<32x128xbf16>, vector<8x128xf32> -> vector<8x128xf32>
    %23 = arith.addf %20, %22 : vector<8x128xf32>
    %24 = vector.extract_strided_slice %23 {offsets = [0, 0], sizes = [8, 32], strides = [1, 1]} : vector<8x128xf32> to vector<8x32xf32>
    %25 = arith.negf %24 : vector<8x32xf32>
    %26 = math.exp %25 : vector<8x32xf32>
    %cst_21 = arith.constant 1.000000e+00 : f32
    %27 = vector.broadcast %cst_21 : f32 to vector<8x32xf32>
    %28 = arith.addf %27, %26 : vector<8x32xf32>
    %29 = arith.divf %27, %28 : vector<8x32xf32>
    %30 = vector.extract_strided_slice %23 {offsets = [0, 32], sizes = [8, 32], strides = [1, 1]} : vector<8x128xf32> to vector<8x32xf32>
    %31 = arith.negf %30 : vector<8x32xf32>
    %32 = math.exp %31 : vector<8x32xf32>
    %cst_22 = arith.constant 1.000000e+00 : f32
    %33 = vector.broadcast %cst_22 : f32 to vector<8x32xf32>
    %34 = arith.addf %33, %32 : vector<8x32xf32>
    %35 = arith.divf %33, %34 : vector<8x32xf32>
    %36 = vector.extract_strided_slice %23 {offsets = [0, 64], sizes = [8, 32], strides = [1, 1]} : vector<8x128xf32> to vector<8x32xf32>
    %37 = math.tanh %36 : vector<8x32xf32>
    %38 = vector.extract_strided_slice %23 {offsets = [0, 96], sizes = [8, 32], strides = [1, 1]} : vector<8x128xf32> to vector<8x32xf32>
    %39 = arith.negf %38 : vector<8x32xf32>
    %40 = math.exp %39 : vector<8x32xf32>
    %cst_23 = arith.constant 1.000000e+00 : f32
    %41 = vector.broadcast %cst_23 : f32 to vector<8x32xf32>
    %42 = arith.addf %41, %40 : vector<8x32xf32>
    %43 = arith.divf %41, %42 : vector<8x32xf32>
    %44 = arith.mulf %35, %17 : vector<8x32xf32>
    %45 = arith.mulf %29, %37 : vector<8x32xf32>
    %46 = arith.addf %44, %45 : vector<8x32xf32>
    %47 = math.tanh %46 : vector<8x32xf32>
    %48 = arith.mulf %43, %47 : vector<8x32xf32>
    %49 = arith.truncf %48 : vector<8x32xf32> to vector<8x32xbf16>
    %50 = arith.index_cast %c0_i32_17 : i32 to index
    %c0_24 = arith.constant 0 : index
    %c0_25 = arith.constant 0 : index
    %51 = vector.load %arg7[%50, %c0_24, %c0_25] : memref<8x8x32xbf16, #tpu.memory_space<vmem>>, vector<1x8x32xbf16>
    %52 = vector.shape_cast %51 : vector<1x8x32xbf16> to vector<8x32xbf16>
    %53 = vector.shape_cast %49 : vector<8x32xbf16> to vector<1x8x32xbf16>
    tpu.vector_store %arg7[%50, %c0_24, %c0_25], %53 {strides = array<i32>} : memref<8x8x32xbf16, #tpu.memory_space<vmem>>, vector<1x8x32xbf16>,
    %c1_i32 = arith.constant 1 : i32
    %54 = arith.index_cast %c1_i32 : i32 to index
    %c0_26 = arith.constant 0 : index
    %c0_27 = arith.constant 0 : index
    %55 = vector.load %arg8[%54, %c0_26, %c0_27] : memref<8x8x128xf32, #tpu.memory_space<vmem>>, vector<1x8x128xf32>
    %56 = vector.shape_cast %55 : vector<1x8x128xf32> to vector<8x128xf32>
    %57 = arith.truncf %48 : vector<8x32xf32> to vector<8x32xbf16>
    %cst_28 = arith.constant dense<0.000000e+00> : vector<8x128xf32>
    %58 = tpu.matmul %57, %6, %cst_28 {dimension_numbers = #tpu.dot_dimension_numbers<[1], [0], [0], [1], [0, 0, 1, 1], [], []>} : vector<8x32xbf16>, vector<32x128xbf16>, vector<8x128xf32> -> vector<8x128xf32>
    %59 = arith.addf %56, %58 : vector<8x128xf32>
    %60 = vector.extract_strided_slice %59 {offsets = [0, 0], sizes = [8, 32], strides = [1, 1]} : vector<8x128xf32> to vector<8x32xf32>
    %61 = arith.negf %60 : vector<8x32xf32>
    %62 = math.exp %61 : vector<8x32xf32>
    %cst_29 = arith.constant 1.000000e+00 : f32
    %63 = vector.broadcast %cst_29 : f32 to vector<8x32xf32>
    %64 = arith.addf %63, %62 : vector<8x32xf32>
    %65 = arith.divf %63, %64 : vector<8x32xf32>
    %66 = vector.extract_strided_slice %59 {offsets = [0, 32], sizes = [8, 32], strides = [1, 1]} : vector<8x128xf32> to vector<8x32xf32>
    %67 = arith.negf %66 : vector<8x32xf32>
    %68 = math.exp %67 : vector<8x32xf32>
    %cst_30 = arith.constant 1.000000e+00 : f32
    %69 = vector.broadcast %cst_30 : f32 to vector<8x32xf32>
    %70 = arith.addf %69, %68 : vector<8x32xf32>
    %71 = arith.divf %69, %70 : vector<8x32xf32>
    %72 = vector.extract_strided_slice %59 {offsets = [0, 64], sizes = [8, 32], strides = [1, 1]} : vector<8x128xf32> to vector<8x32xf32>
    %73 = math.tanh %72 : vector<8x32xf32>
    %74 = vector.extract_strided_slice %59 {offsets = [0, 96], sizes = [8, 32], strides = [1, 1]} : vector<8x128xf32> to vector<8x32xf32>
    %75 = arith.negf %74 : vector<8x32xf32>
    %76 = math.exp %75 : vector<8x32xf32>
    %cst_31 = arith.constant 1.000000e+00 : f32
    %77 = vector.broadcast %cst_31 : f32 to vector<8x32xf32>
    %78 = arith.addf %77, %76 : vector<8x32xf32>
    %79 = arith.divf %77, %78 : vector<8x32xf32>
    %80 = arith.mulf %71, %46 : vector<8x32xf32>
    %81 = arith.mulf %65, %73 : vector<8x32xf32>
    %82 = arith.addf %80, %81 : vector<8x32xf32>
    %83 = math.tanh %82 : vector<8x32xf32>
    %84 = arith.mulf %79, %83 : vector<8x32xf32>
    %85 = arith.truncf %84 : vector<8x32xf32> to vector<8x32xbf16>
    %86 = arith.index_cast %c1_i32 : i32 to index
    %c0_32 = arith.constant 0 : index
    %c0_33 = arith.constant 0 : index
    %87 = vector.load %arg7[%86, %c0_32, %c0_33] : memref<8x8x32xbf16, #tpu.memory_space<vmem>>, vector<1x8x32xbf16>
    %88 = vector.shape_cast %87 : vector<1x8x32xbf16> to vector<8x32xbf16>
    %89 = vector.shape_cast %85 : vector<8x32xbf16> to vector<1x8x32xbf16>
    tpu.vector_store %arg7[%86, %c0_32, %c0_33], %89 {strides = array<i32>} : memref<8x8x32xbf16, #tpu.memory_space<vmem>>, vector<1x8x32xbf16>,
    %c2_i32 = arith.constant 2 : i32
    %90 = arith.index_cast %c2_i32 : i32 to index
    %c0_34 = arith.constant 0 : index
    %c0_35 = arith.constant 0 : index
    %91 = vector.load %arg8[%90, %c0_34, %c0_35] : memref<8x8x128xf32, #tpu.memory_space<vmem>>, vector<1x8x128xf32>
    %92 = vector.shape_cast %91 : vector<1x8x128xf32> to vector<8x128xf32>
    %93 = arith.truncf %84 : vector<8x32xf32> to vector<8x32xbf16>
    %cst_36 = arith.constant dense<0.000000e+00> : vector<8x128xf32>
    %94 = tpu.matmul %93, %6, %cst_36 {dimension_numbers = #tpu.dot_dimension_numbers<[1], [0], [0], [1], [0, 0, 1, 1], [], []>} : vector<8x32xbf16>, vector<32x128xbf16>, vector<8x128xf32> -> vector<8x128xf32>
    %95 = arith.addf %92, %94 : vector<8x128xf32>
    %96 = vector.extract_strided_slice %95 {offsets = [0, 0], sizes = [8, 32], strides = [1, 1]} : vector<8x128xf32> to vector<8x32xf32>
    %97 = arith.negf %96 : vector<8x32xf32>
    %98 = math.exp %97 : vector<8x32xf32>
    %cst_37 = arith.constant 1.000000e+00 : f32
    %99 = vector.broadcast %cst_37 : f32 to vector<8x32xf32>
    %100 = arith.addf %99, %98 : vector<8x32xf32>
    %101 = arith.divf %99, %100 : vector<8x32xf32>
    %102 = vector.extract_strided_slice %95 {offsets = [0, 32], sizes = [8, 32], strides = [1, 1]} : vector<8x128xf32> to vector<8x32xf32>
    %103 = arith.negf %102 : vector<8x32xf32>
    %104 = math.exp %103 : vector<8x32xf32>
    %cst_38 = arith.constant 1.000000e+00 : f32
    %105 = vector.broadcast %cst_38 : f32 to vector<8x32xf32>
    %106 = arith.addf %105, %104 : vector<8x32xf32>
    %107 = arith.divf %105, %106 : vector<8x32xf32>
    %108 = vector.extract_strided_slice %95 {offsets = [0, 64], sizes = [8, 32], strides = [1, 1]} : vector<8x128xf32> to vector<8x32xf32>
    %109 = math.tanh %108 : vector<8x32xf32>
    %110 = vector.extract_strided_slice %95 {offsets = [0, 96], sizes = [8, 32], strides = [1, 1]} : vector<8x128xf32> to vector<8x32xf32>
    %111 = arith.negf %110 : vector<8x32xf32>
    %112 = math.exp %111 : vector<8x32xf32>
    %cst_39 = arith.constant 1.000000e+00 : f32
    %113 = vector.broadcast %cst_39 : f32 to vector<8x32xf32>
    %114 = arith.addf %113, %112 : vector<8x32xf32>
    %115 = arith.divf %113, %114 : vector<8x32xf32>
    %116 = arith.mulf %107, %82 : vector<8x32xf32>
    %117 = arith.mulf %101, %109 : vector<8x32xf32>
    %118 = arith.addf %116, %117 : vector<8x32xf32>
    %119 = math.tanh %118 : vector<8x32xf32>
    %120 = arith.mulf %115, %119 : vector<8x32xf32>
    %121 = arith.truncf %120 : vector<8x32xf32> to vector<8x32xbf16>
    %122 = arith.index_cast %c2_i32 : i32 to index
    %c0_40 = arith.constant 0 : index
    %c0_41 = arith.constant 0 : index
    %123 = vector.load %arg7[%122, %c0_40, %c0_41] : memref<8x8x32xbf16, #tpu.memory_space<vmem>>, vector<1x8x32xbf16>
    %124 = vector.shape_cast %123 : vector<1x8x32xbf16> to vector<8x32xbf16>
    %125 = vector.shape_cast %121 : vector<8x32xbf16> to vector<1x8x32xbf16>
    tpu.vector_store %arg7[%122, %c0_40, %c0_41], %125 {strides = array<i32>} : memref<8x8x32xbf16, #tpu.memory_space<vmem>>, vector<1x8x32xbf16>,
    %c3_i32 = arith.constant 3 : i32
    %126 = arith.index_cast %c3_i32 : i32 to index
    %c0_42 = arith.constant 0 : index
    %c0_43 = arith.constant 0 : index
    %127 = vector.load %arg8[%126, %c0_42, %c0_43] : memref<8x8x128xf32, #tpu.memory_space<vmem>>, vector<1x8x128xf32>
    %128 = vector.shape_cast %127 : vector<1x8x128xf32> to vector<8x128xf32>
    %129 = arith.truncf %120 : vector<8x32xf32> to vector<8x32xbf16>
    %cst_44 = arith.constant dense<0.000000e+00> : vector<8x128xf32>
    %130 = tpu.matmul %129, %6, %cst_44 {dimension_numbers = #tpu.dot_dimension_numbers<[1], [0], [0], [1], [0, 0, 1, 1], [], []>} : vector<8x32xbf16>, vector<32x128xbf16>, vector<8x128xf32> -> vector<8x128xf32>
    %131 = arith.addf %128, %130 : vector<8x128xf32>
    %132 = vector.extract_strided_slice %131 {offsets = [0, 0], sizes = [8, 32], strides = [1, 1]} : vector<8x128xf32> to vector<8x32xf32>
    %133 = arith.negf %132 : vector<8x32xf32>
    %134 = math.exp %133 : vector<8x32xf32>
    %cst_45 = arith.constant 1.000000e+00 : f32
    %135 = vector.broadcast %cst_45 : f32 to vector<8x32xf32>
    %136 = arith.addf %135, %134 : vector<8x32xf32>
    %137 = arith.divf %135, %136 : vector<8x32xf32>
    %138 = vector.extract_strided_slice %131 {offsets = [0, 32], sizes = [8, 32], strides = [1, 1]} : vector<8x128xf32> to vector<8x32xf32>
    %139 = arith.negf %138 : vector<8x32xf32>
    %140 = math.exp %139 : vector<8x32xf32>
    %cst_46 = arith.constant 1.000000e+00 : f32
    %141 = vector.broadcast %cst_46 : f32 to vector<8x32xf32>
    %142 = arith.addf %141, %140 : vector<8x32xf32>
    %143 = arith.divf %141, %142 : vector<8x32xf32>
    %144 = vector.extract_strided_slice %131 {offsets = [0, 64], sizes = [8, 32], strides = [1, 1]} : vector<8x128xf32> to vector<8x32xf32>
    %145 = math.tanh %144 : vector<8x32xf32>
    %146 = vector.extract_strided_slice %131 {offsets = [0, 96], sizes = [8, 32], strides = [1, 1]} : vector<8x128xf32> to vector<8x32xf32>
    %147 = arith.negf %146 : vector<8x32xf32>
    %148 = math.exp %147 : vector<8x32xf32>
    %cst_47 = arith.constant 1.000000e+00 : f32
    %149 = vector.broadcast %cst_47 : f32 to vector<8x32xf32>
    %150 = arith.addf %149, %148 : vector<8x32xf32>
    %151 = arith.divf %149, %150 : vector<8x32xf32>
    %152 = arith.mulf %143, %118 : vector<8x32xf32>
    %153 = arith.mulf %137, %145 : vector<8x32xf32>
    %154 = arith.addf %152, %153 : vector<8x32xf32>
    %155 = math.tanh %154 : vector<8x32xf32>
    %156 = arith.mulf %151, %155 : vector<8x32xf32>
    %157 = arith.truncf %156 : vector<8x32xf32> to vector<8x32xbf16>
    %158 = arith.index_cast %c3_i32 : i32 to index
    %c0_48 = arith.constant 0 : index
    %c0_49 = arith.constant 0 : index
    %159 = vector.load %arg7[%158, %c0_48, %c0_49] : memref<8x8x32xbf16, #tpu.memory_space<vmem>>, vector<1x8x32xbf16>
    %160 = vector.shape_cast %159 : vector<1x8x32xbf16> to vector<8x32xbf16>
    %161 = vector.shape_cast %157 : vector<8x32xbf16> to vector<1x8x32xbf16>
    tpu.vector_store %arg7[%158, %c0_48, %c0_49], %161 {strides = array<i32>} : memref<8x8x32xbf16, #tpu.memory_space<vmem>>, vector<1x8x32xbf16>,
    %c4_i32 = arith.constant 4 : i32
    %162 = arith.index_cast %c4_i32 : i32 to index
    %c0_50 = arith.constant 0 : index
    %c0_51 = arith.constant 0 : index
    %163 = vector.load %arg8[%162, %c0_50, %c0_51] : memref<8x8x128xf32, #tpu.memory_space<vmem>>, vector<1x8x128xf32>
    %164 = vector.shape_cast %163 : vector<1x8x128xf32> to vector<8x128xf32>
    %165 = arith.truncf %156 : vector<8x32xf32> to vector<8x32xbf16>
    %cst_52 = arith.constant dense<0.000000e+00> : vector<8x128xf32>
    %166 = tpu.matmul %165, %6, %cst_52 {dimension_numbers = #tpu.dot_dimension_numbers<[1], [0], [0], [1], [0, 0, 1, 1], [], []>} : vector<8x32xbf16>, vector<32x128xbf16>, vector<8x128xf32> -> vector<8x128xf32>
    %167 = arith.addf %164, %166 : vector<8x128xf32>
    %168 = vector.extract_strided_slice %167 {offsets = [0, 0], sizes = [8, 32], strides = [1, 1]} : vector<8x128xf32> to vector<8x32xf32>
    %169 = arith.negf %168 : vector<8x32xf32>
    %170 = math.exp %169 : vector<8x32xf32>
    %cst_53 = arith.constant 1.000000e+00 : f32
    %171 = vector.broadcast %cst_53 : f32 to vector<8x32xf32>
    %172 = arith.addf %171, %170 : vector<8x32xf32>
    %173 = arith.divf %171, %172 : vector<8x32xf32>
    %174 = vector.extract_strided_slice %167 {offsets = [0, 32], sizes = [8, 32], strides = [1, 1]} : vector<8x128xf32> to vector<8x32xf32>
    %175 = arith.negf %174 : vector<8x32xf32>
    %176 = math.exp %175 : vector<8x32xf32>
    %cst_54 = arith.constant 1.000000e+00 : f32
    %177 = vector.broadcast %cst_54 : f32 to vector<8x32xf32>
    %178 = arith.addf %177, %176 : vector<8x32xf32>
    %179 = arith.divf %177, %178 : vector<8x32xf32>
    %180 = vector.extract_strided_slice %167 {offsets = [0, 64], sizes = [8, 32], strides = [1, 1]} : vector<8x128xf32> to vector<8x32xf32>
    %181 = math.tanh %180 : vector<8x32xf32>
    %182 = vector.extract_strided_slice %167 {offsets = [0, 96], sizes = [8, 32], strides = [1, 1]} : vector<8x128xf32> to vector<8x32xf32>
    %183 = arith.negf %182 : vector<8x32xf32>
    %184 = math.exp %183 : vector<8x32xf32>
    %cst_55 = arith.constant 1.000000e+00 : f32
    %185 = vector.broadcast %cst_55 : f32 to vector<8x32xf32>
    %186 = arith.addf %185, %184 : vector<8x32xf32>
    %187 = arith.divf %185, %186 : vector<8x32xf32>
    %188 = arith.mulf %179, %154 : vector<8x32xf32>
    %189 = arith.mulf %173, %181 : vector<8x32xf32>
    %190 = arith.addf %188, %189 : vector<8x32xf32>
    %191 = math.tanh %190 : vector<8x32xf32>
    %192 = arith.mulf %187, %191 : vector<8x32xf32>
    %193 = arith.truncf %192 : vector<8x32xf32> to vector<8x32xbf16>
    %194 = arith.index_cast %c4_i32 : i32 to index
    %c0_56 = arith.constant 0 : index
    %c0_57 = arith.constant 0 : index
    %195 = vector.load %arg7[%194, %c0_56, %c0_57] : memref<8x8x32xbf16, #tpu.memory_space<vmem>>, vector<1x8x32xbf16>
    %196 = vector.shape_cast %195 : vector<1x8x32xbf16> to vector<8x32xbf16>
    %197 = vector.shape_cast %193 : vector<8x32xbf16> to vector<1x8x32xbf16>
    tpu.vector_store %arg7[%194, %c0_56, %c0_57], %197 {strides = array<i32>} : memref<8x8x32xbf16, #tpu.memory_space<vmem>>, vector<1x8x32xbf16>,
    %c5_i32 = arith.constant 5 : i32
    %198 = arith.index_cast %c5_i32 : i32 to index
    %c0_58 = arith.constant 0 : index
    %c0_59 = arith.constant 0 : index
    %199 = vector.load %arg8[%198, %c0_58, %c0_59] : memref<8x8x128xf32, #tpu.memory_space<vmem>>, vector<1x8x128xf32>
    %200 = vector.shape_cast %199 : vector<1x8x128xf32> to vector<8x128xf32>
    %201 = arith.truncf %192 : vector<8x32xf32> to vector<8x32xbf16>
    %cst_60 = arith.constant dense<0.000000e+00> : vector<8x128xf32>
    %202 = tpu.matmul %201, %6, %cst_60 {dimension_numbers = #tpu.dot_dimension_numbers<[1], [0], [0], [1], [0, 0, 1, 1], [], []>} : vector<8x32xbf16>, vector<32x128xbf16>, vector<8x128xf32> -> vector<8x128xf32>
    %203 = arith.addf %200, %202 : vector<8x128xf32>
    %204 = vector.extract_strided_slice %203 {offsets = [0, 0], sizes = [8, 32], strides = [1, 1]} : vector<8x128xf32> to vector<8x32xf32>
    %205 = arith.negf %204 : vector<8x32xf32>
    %206 = math.exp %205 : vector<8x32xf32>
    %cst_61 = arith.constant 1.000000e+00 : f32
    %207 = vector.broadcast %cst_61 : f32 to vector<8x32xf32>
    %208 = arith.addf %207, %206 : vector<8x32xf32>
    %209 = arith.divf %207, %208 : vector<8x32xf32>
    %210 = vector.extract_strided_slice %203 {offsets = [0, 32], sizes = [8, 32], strides = [1, 1]} : vector<8x128xf32> to vector<8x32xf32>
    %211 = arith.negf %210 : vector<8x32xf32>
    %212 = math.exp %211 : vector<8x32xf32>
    %cst_62 = arith.constant 1.000000e+00 : f32
    %213 = vector.broadcast %cst_62 : f32 to vector<8x32xf32>
    %214 = arith.addf %213, %212 : vector<8x32xf32>
    %215 = arith.divf %213, %214 : vector<8x32xf32>
    %216 = vector.extract_strided_slice %203 {offsets = [0, 64], sizes = [8, 32], strides = [1, 1]} : vector<8x128xf32> to vector<8x32xf32>
    %217 = math.tanh %216 : vector<8x32xf32>
    %218 = vector.extract_strided_slice %203 {offsets = [0, 96], sizes = [8, 32], strides = [1, 1]} : vector<8x128xf32> to vector<8x32xf32>
    %219 = arith.negf %218 : vector<8x32xf32>
    %220 = math.exp %219 : vector<8x32xf32>
    %cst_63 = arith.constant 1.000000e+00 : f32
    %221 = vector.broadcast %cst_63 : f32 to vector<8x32xf32>
    %222 = arith.addf %221, %220 : vector<8x32xf32>
    %223 = arith.divf %221, %222 : vector<8x32xf32>
    %224 = arith.mulf %215, %190 : vector<8x32xf32>
    %225 = arith.mulf %209, %217 : vector<8x32xf32>
    %226 = arith.addf %224, %225 : vector<8x32xf32>
    %227 = math.tanh %226 : vector<8x32xf32>
    %228 = arith.mulf %223, %227 : vector<8x32xf32>
    %229 = arith.truncf %228 : vector<8x32xf32> to vector<8x32xbf16>
    %230 = arith.index_cast %c5_i32 : i32 to index
    %c0_64 = arith.constant 0 : index
    %c0_65 = arith.constant 0 : index
    %231 = vector.load %arg7[%230, %c0_64, %c0_65] : memref<8x8x32xbf16, #tpu.memory_space<vmem>>, vector<1x8x32xbf16>
    %232 = vector.shape_cast %231 : vector<1x8x32xbf16> to vector<8x32xbf16>
    %233 = vector.shape_cast %229 : vector<8x32xbf16> to vector<1x8x32xbf16>
    tpu.vector_store %arg7[%230, %c0_64, %c0_65], %233 {strides = array<i32>} : memref<8x8x32xbf16, #tpu.memory_space<vmem>>, vector<1x8x32xbf16>,
    %c6_i32 = arith.constant 6 : i32
    %234 = arith.index_cast %c6_i32 : i32 to index
    %c0_66 = arith.constant 0 : index
    %c0_67 = arith.constant 0 : index
    %235 = vector.load %arg8[%234, %c0_66, %c0_67] : memref<8x8x128xf32, #tpu.memory_space<vmem>>, vector<1x8x128xf32>
    %236 = vector.shape_cast %235 : vector<1x8x128xf32> to vector<8x128xf32>
    %237 = arith.truncf %228 : vector<8x32xf32> to vector<8x32xbf16>
    %cst_68 = arith.constant dense<0.000000e+00> : vector<8x128xf32>
    %238 = tpu.matmul %237, %6, %cst_68 {dimension_numbers = #tpu.dot_dimension_numbers<[1], [0], [0], [1], [0, 0, 1, 1], [], []>} : vector<8x32xbf16>, vector<32x128xbf16>, vector<8x128xf32> -> vector<8x128xf32>
    %239 = arith.addf %236, %238 : vector<8x128xf32>
    %240 = vector.extract_strided_slice %239 {offsets = [0, 0], sizes = [8, 32], strides = [1, 1]} : vector<8x128xf32> to vector<8x32xf32>
    %241 = arith.negf %240 : vector<8x32xf32>
    %242 = math.exp %241 : vector<8x32xf32>
    %cst_69 = arith.constant 1.000000e+00 : f32
    %243 = vector.broadcast %cst_69 : f32 to vector<8x32xf32>
    %244 = arith.addf %243, %242 : vector<8x32xf32>
    %245 = arith.divf %243, %244 : vector<8x32xf32>
    %246 = vector.extract_strided_slice %239 {offsets = [0, 32], sizes = [8, 32], strides = [1, 1]} : vector<8x128xf32> to vector<8x32xf32>
    %247 = arith.negf %246 : vector<8x32xf32>
    %248 = math.exp %247 : vector<8x32xf32>
    %cst_70 = arith.constant 1.000000e+00 : f32
    %249 = vector.broadcast %cst_70 : f32 to vector<8x32xf32>
    %250 = arith.addf %249, %248 : vector<8x32xf32>
    %251 = arith.divf %249, %250 : vector<8x32xf32>
    %252 = vector.extract_strided_slice %239 {offsets = [0, 64], sizes = [8, 32], strides = [1, 1]} : vector<8x128xf32> to vector<8x32xf32>
    %253 = math.tanh %252 : vector<8x32xf32>
    %254 = vector.extract_strided_slice %239 {offsets = [0, 96], sizes = [8, 32], strides = [1, 1]} : vector<8x128xf32> to vector<8x32xf32>
    %255 = arith.negf %254 : vector<8x32xf32>
    %256 = math.exp %255 : vector<8x32xf32>
    %cst_71 = arith.constant 1.000000e+00 : f32
    %257 = vector.broadcast %cst_71 : f32 to vector<8x32xf32>
    %258 = arith.addf %257, %256 : vector<8x32xf32>
    %259 = arith.divf %257, %258 : vector<8x32xf32>
    %260 = arith.mulf %251, %226 : vector<8x32xf32>
    %261 = arith.mulf %245, %253 : vector<8x32xf32>
    %262 = arith.addf %260, %261 : vector<8x32xf32>
    %263 = math.tanh %262 : vector<8x32xf32>
    %264 = arith.mulf %259, %263 : vector<8x32xf32>
    %265 = arith.truncf %264 : vector<8x32xf32> to vector<8x32xbf16>
    %266 = arith.index_cast %c6_i32 : i32 to index
    %c0_72 = arith.constant 0 : index
    %c0_73 = arith.constant 0 : index
    %267 = vector.load %arg7[%266, %c0_72, %c0_73] : memref<8x8x32xbf16, #tpu.memory_space<vmem>>, vector<1x8x32xbf16>
    %268 = vector.shape_cast %267 : vector<1x8x32xbf16> to vector<8x32xbf16>
    %269 = vector.shape_cast %265 : vector<8x32xbf16> to vector<1x8x32xbf16>
    tpu.vector_store %arg7[%266, %c0_72, %c0_73], %269 {strides = array<i32>} : memref<8x8x32xbf16, #tpu.memory_space<vmem>>, vector<1x8x32xbf16>,
    %c7_i32 = arith.constant 7 : i32
    %270 = arith.index_cast %c7_i32 : i32 to index
    %c0_74 = arith.constant 0 : index
    %c0_75 = arith.constant 0 : index
    %271 = vector.load %arg8[%270, %c0_74, %c0_75] : memref<8x8x128xf32, #tpu.memory_space<vmem>>, vector<1x8x128xf32>
    %272 = vector.shape_cast %271 : vector<1x8x128xf32> to vector<8x128xf32>
    %273 = arith.truncf %264 : vector<8x32xf32> to vector<8x32xbf16>
    %cst_76 = arith.constant dense<0.000000e+00> : vector<8x128xf32>
    %274 = tpu.matmul %273, %6, %cst_76 {dimension_numbers = #tpu.dot_dimension_numbers<[1], [0], [0], [1], [0, 0, 1, 1], [], []>} : vector<8x32xbf16>, vector<32x128xbf16>, vector<8x128xf32> -> vector<8x128xf32>
    %275 = arith.addf %272, %274 : vector<8x128xf32>
    %276 = vector.extract_strided_slice %275 {offsets = [0, 0], sizes = [8, 32], strides = [1, 1]} : vector<8x128xf32> to vector<8x32xf32>
    %277 = arith.negf %276 : vector<8x32xf32>
    %278 = math.exp %277 : vector<8x32xf32>
    %cst_77 = arith.constant 1.000000e+00 : f32
    %279 = vector.broadcast %cst_77 : f32 to vector<8x32xf32>
    %280 = arith.addf %279, %278 : vector<8x32xf32>
    %281 = arith.divf %279, %280 : vector<8x32xf32>
    %282 = vector.extract_strided_slice %275 {offsets = [0, 32], sizes = [8, 32], strides = [1, 1]} : vector<8x128xf32> to vector<8x32xf32>
    %283 = arith.negf %282 : vector<8x32xf32>
    %284 = math.exp %283 : vector<8x32xf32>
    %cst_78 = arith.constant 1.000000e+00 : f32
    %285 = vector.broadcast %cst_78 : f32 to vector<8x32xf32>
    %286 = arith.addf %285, %284 : vector<8x32xf32>
    %287 = arith.divf %285, %286 : vector<8x32xf32>
    %288 = vector.extract_strided_slice %275 {offsets = [0, 64], sizes = [8, 32], strides = [1, 1]} : vector<8x128xf32> to vector<8x32xf32>
    %289 = math.tanh %288 : vector<8x32xf32>
    %290 = vector.extract_strided_slice %275 {offsets = [0, 96], sizes = [8, 32], strides = [1, 1]} : vector<8x128xf32> to vector<8x32xf32>
    %291 = arith.negf %290 : vector<8x32xf32>
    %292 = math.exp %291 : vector<8x32xf32>
    %cst_79 = arith.constant 1.000000e+00 : f32
    %293 = vector.broadcast %cst_79 : f32 to vector<8x32xf32>
    %294 = arith.addf %293, %292 : vector<8x32xf32>
    %295 = arith.divf %293, %294 : vector<8x32xf32>
    %296 = arith.mulf %287, %262 : vector<8x32xf32>
    %297 = arith.mulf %281, %289 : vector<8x32xf32>
    %298 = arith.addf %296, %297 : vector<8x32xf32>
    %299 = math.tanh %298 : vector<8x32xf32>
    %300 = arith.mulf %295, %299 : vector<8x32xf32>
    %301 = arith.truncf %300 : vector<8x32xf32> to vector<8x32xbf16>
    %302 = arith.index_cast %c7_i32 : i32 to index
    %c0_80 = arith.constant 0 : index
    %c0_81 = arith.constant 0 : index
    %303 = vector.load %arg7[%302, %c0_80, %c0_81] : memref<8x8x32xbf16, #tpu.memory_space<vmem>>, vector<1x8x32xbf16>
    %304 = vector.shape_cast %303 : vector<1x8x32xbf16> to vector<8x32xbf16>
    %305 = vector.shape_cast %301 : vector<8x32xbf16> to vector<1x8x32xbf16>
    tpu.vector_store %arg7[%302, %c0_80, %c0_81], %305 {strides = array<i32>} : memref<8x8x32xbf16, #tpu.memory_space<vmem>>, vector<1x8x32xbf16>,
    %c8_i32 = arith.constant 8 : i32
    %c0_82 = arith.constant 0 : index
    %c0_83 = arith.constant 0 : index
    %c0_84 = arith.constant 0 : index
    %306 = vector.load %arg5[%c0_82, %c0_83, %c0_84] : memref<1x8x32xf32, #tpu.memory_space<vmem>>, vector<1x8x32xf32>
    %307 = vector.shape_cast %306 : vector<1x8x32xf32> to vector<8x32xf32>
    %308 = vector.shape_cast %300 : vector<8x32xf32> to vector<1x8x32xf32>
    tpu.vector_store %arg5[%c0_82, %c0_83, %c0_84], %308 {strides = array<i32>} : memref<1x8x32xf32, #tpu.memory_space<vmem>>, vector<1x8x32xf32>,
    %c0_85 = arith.constant 0 : index
    %c0_86 = arith.constant 0 : index
    %c0_87 = arith.constant 0 : index
    %309 = vector.load %arg6[%c0_85, %c0_86, %c0_87] : memref<1x8x32xf32, #tpu.memory_space<vmem>>, vector<1x8x32xf32>
    %310 = vector.shape_cast %309 : vector<1x8x32xf32> to vector<8x32xf32>
    %311 = vector.shape_cast %298 : vector<8x32xf32> to vector<1x8x32xf32>
    tpu.vector_store %arg6[%c0_85, %c0_86, %c0_87], %311 {strides = array<i32>} : memref<1x8x32xf32, #tpu.memory_space<vmem>>, vector<1x8x32xf32>,
    return
  }
  func.func @transform_1(%arg0: i32) -> (i32, i32, i32) {
    %c0_i32 = arith.constant 0 : i32
    %c0_i32_0 = arith.constant 0 : i32
    %c0_i32_1 = arith.constant 0 : i32
    return %arg0, %c0_i32, %c0_i32_0 : i32, i32, i32
  }
  func.func @transform_2(%arg0: i32) -> (i32, i32, i32) {
    %c0_i32 = arith.constant 0 : i32
    %c0_i32_0 = arith.constant 0 : i32
    %c0_i32_1 = arith.constant 0 : i32
    return %arg0, %c0_i32, %c0_i32_0 : i32, i32, i32
  }
  func.func @transform_3(%arg0: i32) -> (i32, i32, i32) {
    %c0_i32 = arith.constant 0 : i32
    %c0_i32_0 = arith.constant 0 : i32
    %c0_i32_1 = arith.constant 0 : i32
    return %arg0, %c0_i32, %c0_i32_0 : i32, i32, i32
  }
  func.func @transform_4(%arg0: i32) -> (i32, i32, i32) {
    %c0_i32 = arith.constant 0 : i32
    %c0_i32_0 = arith.constant 0 : i32
    %c0_i32_1 = arith.constant 0 : i32
    return %arg0, %c0_i32, %c0_i32_0 : i32, i32, i32
  }
  func.func @transform_5(%arg0: i32) -> (i32, i32, i32) {
    %c0_i32 = arith.constant 0 : i32
    %c0_i32_0 = arith.constant 0 : i32
    %c0_i32_1 = arith.constant 0 : i32
    return %arg0, %c0_i32, %c0_i32_0 : i32, i32, i32
  }
}

</mosaic_0001>

<bundles_post_ra>
// kernel: tpu_custom_call.1
= control target key start
LH: loop header
LB: loop body
LE: loop exit
PB: predicated region body
PF: predicated region fallthrough
CT: control target
= control target key end

     0   :  { %s2312_s0 = inlined_call_operand.hbm [shape: bf16[8,8,32], index: 0, kind: input, shape index: {}]   ;;  %s2313_s1 = inlined_call_operand.hbm [shape: bf16[2,32,128], index: 1, kind: input, shape index: {}]   ;;  %s2314_s2 = inlined_call_operand.hbm [shape: bf16[2,32,128], index: 2, kind: input, shape index: {}]   ;;  %s2315_s3 = inlined_call_operand.vmem [shape: f32[2,1,128], index: 3, kind: input, shape index: {}]   ;;  %s2316_s4 = inlined_call_operand.hbm [shape: f32[2,8,32], index: 4, kind: output, shape index: {0}]   ;;  %s2317_s5 = inlined_call_operand.hbm [shape: f32[2,8,32], index: 5, kind: output, shape index: {1}]  }
   0x1   :  { %2322 = sst [smem:[#allocation22_spill]] %s2313_s1 }
   0x2   :  { %11 = vsyncpa [#allocation6], 0 }
   0x3   :  { %13 = vsyncpa [#allocation6 + $0x1], 0 }
   0x4   :  { %14 = vsyncpa [#allocation9], 0 }
   0x5   :  { %16 = vsyncpa [#allocation9 + $0x1], 0 }
   0x6   :  { %17 = vsyncpa [#allocation7], 0 }
   0x7   :  { %19 = vsyncpa [#allocation7 + $0x1], 0 }
   0x8   :  { %20 = vsyncpa [#allocation12], 0 }
   0x9   :  { %22 = vsyncpa [#allocation12 + $0x1], 0  ;;  %s1835_s18 = smov 0   ;;  %s1837_s19 = smov 0  }
   0xa   :  { %s1839_s20 = smov 0   ;;  %s1841_s21 = smov 0  }
   0xb LB: > { %s1856_s22 = sadd.s32 4294967295, %s1790_s21   ;;  %s1283_s23 = sadd.s32 4294967294, %s1790_s21   ;;  %s1790_s21 = sphi %s1841_s21, %s2343_s21   ;;  %s1786_s20 = sphi %s1839_s20, %s2342_s20   ;;  %s1782_s19 = sphi %s1837_s19, %s2341_s19   ;;  %s1778_s18 = sphi %s1835_s18, %s2340_s18  }
   0xc   : > { %s1860_s24 = sadd.s32 1, %s1790_s21   ;;  %s35_s25 = sadd.s32 1, %s1786_s20 }
   0xd   : > { %s32_s26 = ssub.s32 %s1790_s21, %s1860_s24  ;;  %p42_p0 = scmp.ne.s32.totalorder %s1786_s20, %s1782_s19 }
   0xe   : > { %p33_p1 = scmp.eq.s32.totalorder %s32_s26, 0  ;;  %p43_p2 = scmp.eq.s32.totalorder %s1790_s21, 0 }
   0xf   : > { %p48_p3 = scmp.ne.s32.totalorder %s1782_s19, %s1778_s18  ;;  %p2318_p4 = scmp.eq.s32.totalorder %s1856_s22, 0 }
  0x10   : > { %s1872_s27 = scalar_select %p33_p1, %s1786_s20, %s35_s25  }
  0x11   : > { %p1874_p5 = por %p43_p2, %p42_p0  ;;  %p1880_p6 = por %p2318_p4, %p48_p3 }
  0x12   : > { %p124_p7 = scmp.eq.s32.totalorder %s1856_s22, 1  ;;  %p130_p8 = scmp.eq.s32.totalorder %s1283_s23, 1 }
  0x13   : > { %s2324_s29 = scalar_select %p1880_p6, 1, 0 }
  0x14   : > { %p1482_p10 = scmp.lt.s32.totalorder %s1790_s21, 2  ;;  %p1887_p11 = por %p124_p7, %p42_p0 }
  0x15   : > { %p1891_p12 = por %p130_p8, %p48_p3  ;;  %s1896_s7 = sand.u32 1, %s1786_s20  }
  0x16   : > { %s2325_s30 = scalar_select %p1887_p11, 1, 0 }
  0x17   : > { %s2326_s6 = scalar_select %p1891_p12, 1, 0 }
  0x18   : > { %s1341_s8 = sshll.u32 %s1790_s21, 8  ;;  %s1286_s9 = sshll.u32 %s1896_s7, 4 }
  0x19   : > { %s2327_s1 = sld [smem:[#allocation22_spill]]  ;;  %s180_s13 = scalar_lea.vmem [#allocation5], %s1286_s9 }
  0x1a   : > { %s187_s14 = sshll.u32 %s180_s13, 4  ;;  %p1911_p13 = pnand %p1482_p10, %p1874_p5  ;;  %s1915_s14 = int_to_ptr.vmem [resolvable:$true] %s187_s14 }
  0x1b   : > { %s177_s16 = scalar_lea.sflag [#allocation6], %s1896_s7 }
  0x1c   : > { %p1600_p1 = pneg %p1911_p13 }
  0x1f   : > { %s1905_s12 = scalar_lea.hbm %s2327_s1, %s1341_s8  ;;  %s1603_s26 = scalar_lea.hbm %s2327_s1, 512 }
  0x20   : > { %s1598_s17 = scalar_lea.hbm %s1905_s12, 256  ;;  %p1604_p5 = scmp.lt.u32.totalorder %s1905_s12, %s2327_s1 }
  0x21   : > { %p1599_p0 = scmp.ne.s32.totalorder %s1905_s12, %s1598_s17  ;;  %p1605_p7 = scmp.lt.u32.totalorder %s1603_s26, %s1598_s17 }
  0x22   : > { %p1607_p10 = scmp.lt.u32.totalorder %s1598_s17, %s1905_s12 }
  0x23   : > { %p1601_p2 = pnand %p1600_p1, %p1599_p0  ;;  %p1606_p8 = por %p1605_p7, %p1604_p5 }
  0x25   : > { %p1602_p3 = pneg %p1601_p2  ;;  %p1608_p9 = por %p1607_p10, %p1606_p8 }
  0x27   : > { %p1609_p4 = pnand %p1608_p9, %p1602_p3 }
  0x29   : > { %1612 = shalt.err (!%p1609_p4)
}
  0x2a   : > { %s1613_s11 = scalar_lea.vmem %s1915_s14, 256  ;;  %s1792_s13 = smov [#allocation5]  }
  0x2b   : > { %p1614_p0 = scmp.ne.s32.totalorder %s1915_s14, %s1613_s11  ;;  %s1618_s23 = sshll.u32 %s1792_s13, 4  ;;  %s1619_s23 = int_to_ptr.vmem [resolvable:$false] %s1618_s23 }
  0x2c   : > { %s1620_s25 = scalar_lea.vmem %s1619_s23, 512  ;;  %p1621_p11 = scmp.lt.s32.totalorder %s1915_s14, %s1619_s23 }
  0x2d   : > { %p1616_p2 = pnand %p1614_p0, %p1600_p1  ;;  %p1622_p5 = scmp.lt.s32.totalorder %s1620_s25, %s1613_s11 }
  0x2f   : > { %p1617_p12 = pneg %p1616_p2  ;;  %p1623_p7 = por %p1622_p5, %p1621_p11 }
  0x31   : > { %p1624_p8 = pnand %p1623_p7, %p1617_p12 }
  0x33   : > { %1627 = shalt.err (!%p1624_p8)
}
  0x34   : > { %s2320_s17 = smov 64   ;;  %s1794_s26 = smov 4  }
  0x35   : > { %1471 = dma.hbm_to_vmem [thread:$0]  (!%p1911_p13), %s1905_s12, 256, %s1915_s14, %s177_s16, %s2320_s17, %s2320_s17, %s1794_s26  }
  0x36   : > { %p1292_p4 = scmp.ge.s32.totalorder %s1790_s21, 1  ;;  %p222_p9 = scmp.lt.s32.totalorder %s1790_s21, 3 }
  0x37   : > { %s1959_s13 = scalar_lea.hbm %s2314_s2, %s1341_s8  ;;  %s201_s23 = scalar_lea.vmem [#allocation8], %s1286_s9 }
  0x38   : > { %p1950_p11 = pnand %p1292_p4, %p222_p9  ;;  %s208_s25 = sshll.u32 %s201_s23, 4  ;;  %s1963_s25 = int_to_ptr.vmem [resolvable:$true] %s208_s25 }
  0x39   : > { %s198_s12 = scalar_lea.sflag [#allocation9], %s1896_s7  ;;  %s1628_s14 = scalar_lea.hbm %s1959_s13, 256 }
  0x3a   : > { %p1629_p12 = scmp.ne.s32.totalorder %s1959_s13, %s1628_s14  ;;  %s1633_s8 = scalar_lea.hbm %s2314_s2, 512 }
  0x3b   : > { %p1634_p0 = scmp.lt.u32.totalorder %s1959_s13, %s2314_s2  ;;  %p1635_p2 = scmp.lt.u32.totalorder %s1633_s8, %s1628_s14 }
  0x3c   : > { %p1631_p3 = pnand %p1629_p12, %p1600_p1  ;;  %p1637_p7 = scmp.lt.u32.totalorder %s1628_s14, %s1959_s13 }
  0x3d   : > { %p1636_p5 = por %p1635_p2, %p1634_p0 }
  0x3e   : > { %p1632_p10 = pneg %p1631_p3 }
  0x3f   : > { %p1638_p8 = por %p1637_p7, %p1636_p5 }
  0x41   : > { %p1639_p4 = pnand %p1638_p8, %p1632_p10 }
  0x43   : > { %1642 = shalt.err (!%p1639_p4)
}
  0x44   : > { %s1643_s9 = scalar_lea.vmem %s1963_s25, 256  ;;  %s1795_s23 = smov [#allocation8]  }
  0x45   : > { %p1644_p9 = scmp.ne.s32.totalorder %s1963_s25, %s1643_s9  ;;  %s1648_s16 = sshll.u32 %s1795_s23, 4  ;;  %s1649_s16 = int_to_ptr.vmem [resolvable:$false] %s1648_s16 }
  0x46   : > { %s1650_s17 = scalar_lea.vmem %s1649_s16, 512  ;;  %p1651_p6 = scmp.lt.s32.totalorder %s1963_s25, %s1649_s16 }
  0x47   : > { %p1646_p12 = pnand %p1644_p9, %p1600_p1  ;;  %p1652_p0 = scmp.lt.s32.totalorder %s1650_s17, %s1643_s9 }
  0x49   : > { %p1647_p3 = pneg %p1646_p12  ;;  %p1653_p2 = por %p1652_p0, %p1651_p6 }
  0x4b   : > { %p1654_p5 = pnand %p1653_p2, %p1647_p3 }
  0x4d   : > { %1657 = shalt.err (!%p1654_p5)
}
  0x4e   : > { %s2330_s14 = smov 64   ;;  %226 = sbr.rel (%p1950_p11) target bundleno = 5776 (0x1690), region = 32 }
  0x4f   : > { %1474 = dma.hbm_to_vmem [thread:$0]  (!%p1911_p13), %s1959_s13, 256, %s1963_s25, %s198_s12, %s2330_s14, %s2330_s14, %s1794_s26  }
  0x50   : > { %s1997_s10 = sand.u32 (!%p1950_p11), 1, %s1782_s19   ;;  %p2331_p6 = scmp.ne.s32.totalorder (!%p1950_p11), %s2324_s29, 0 }
  0x51   : > { %s1293_s8 = sshll.u32 (!%p1950_p11), %s1997_s10, 4  ;;  %s229_s11 = scalar_lea.sflag (!%p1950_p11), [#allocation6], %s1997_s10 }
  0x52   : > { %s2001_s15 = scalar_lea.vmem (!%p1950_p11), [#allocation5], %s1293_s8 }
  0x55   : > { %1757 = dma.done.wait (%p2331_p6), %s229_s11, 256  }
  0x56   : > { %1759 = vsyncadd (%p2331_p6), %s229_s11, 4294967040  ;;  %s238_s7 = scalar_lea.sflag [#allocation9], %s1997_s10  ;;  %s2008_s26 = scalar_lea.vmem [#allocation8], %s1293_s8 }
  0x57   : > { %1761 = dma.done.wait (%p2331_p6), %s238_s7, 256  }
  0x58   : > { %1763 = vsyncadd (%p2331_p6), %s238_s7, 4294967040  ;;  %s1295_s28 = sshll.u32 %s1997_s10, 3  ;;  %p279_p13 = scmp.lt.s32.totalorder %s1856_s22, 1 }
  0x59   : > { %s1796_s23 = smov [#allocation2]   ;;  %s1658_s29 = scalar_lea.hbm %s2312_s0, 512 }
  0x5a   : > { %s2017_s13 = scalar_select %p279_p13, %s1856_s22, 1 }
  0x5b   : > { %s294_s16 = sshll.u32 %s1796_s23, 4  ;;  %p1659_p1 = scmp.ne.s32.totalorder %s2312_s0, %s1658_s29  ;;  %s295_s16 = int_to_ptr.vmem [resolvable:$true] %s294_s16 }
  0x5c   : > { %s281_s9 = scalar_lea.vmem %s2315_s3, %s2017_s13  ;;  %p2332_p11 = scmp.eq.s32.totalorder %s1856_s22, 0 }
  0x5d   : > { %p1664_p8 = scmp.lt.u32.totalorder %s1658_s29, %s2312_s0 }
  0x5e   : > { %p1660_p10 = pnand %p1659_p1, %p2332_p11 }
  0x60   : > { %p1661_p7 = pneg %p1660_p10 }
  0x62   : > { %p1666_p4 = pnand %p1664_p8, %p1661_p7 }
  0x64   : > { %1669 = shalt.err (!%p1666_p4)  }
  0x65   : > { %s1670_s25 = scalar_lea.vmem %s295_s16, 512  ;;  %p2333_p12 = pmov %p2332_p11 }
  0x66   : > { %p1671_p9 = scmp.ne.s32.totalorder %s295_s16, %s1670_s25  ;;  %p1677_p2 = scmp.lt.s32.totalorder %s295_s16, %s295_s16 }
  0x67   : > { %p1678_p5 = scmp.lt.s32.totalorder %s1670_s25, %s1670_s25 }
  0x68   : > { %p1672_p3 = pnand %p1671_p9, %p2333_p12 }
  0x69   : > { %p1679_p6 = por %p1678_p5, %p1677_p2 }
  0x6a   : > { %p1673_p0 = pneg %p1672_p3 }
  0x6c   : > { %p1680_p13 = pnand %p1679_p6, %p1673_p0 }
  0x6e   : > { %1683 = shalt.err (!%p1680_p13)  }
  0x6f   : > { %p2334_p1 = pmov %p2332_p11  ;;  %s2041_s1 = scalar_lea.vmem [#allocation10], %s1295_s28 }
  0x70   : > { %s2043_s17 = scalar_lea.vmem [#allocation11], %s1295_s28 }
  0x71   : > { %1462 = dma.hbm_to_vmem [thread:$0]  (%p2334_p1), %s2312_s0, 512, %s295_s16, [#allocation4] }
  0x72   : > { %p2335_p11 = pmov %p2334_p1 }
  0x73   : > { %p2336_p10 = pmov %p2334_p1 }
  0x74   : > { %1765 = dma.done.wait (%p2335_p11), [#allocation4], 512 }
  0x75   : > { %1767 = vsyncadd (%p2336_p10), [#allocation4], 4294966784  ;;  %v1797_v0 = vmov 0.0   ;;  %vm1798_vm0 = vmmov 0   ;;  %v1526_v1 = vld [vmem:[%s2001_s15] sm:$0xff]   ;;  %v1528_v3 = vld [vmem:[%s2001_s15 + $0x8] sm:$0xff]  }
  0x76   : > { %1393 = vmatprep.subr.bf16.mxu1 %v1797_v0  ;;  %1397 = vmatprep.mubr.msk.bf16.mxu1 %vm1798_vm0, %v1797_v0  ;;  %v2054_v2 = vld [vmem:[%s2008_s26] sm:$0xff]   ;;  %v2059_v4 = vld [vmem:[%s2008_s26 + $0x8] sm:$0xff]   ;;  %vm358_vm1 = vcmask 261120   ;;  %v1799_v7 = vmov 0   ;;  %s1800_s28 = smov 64   ;;  %s1801_s13 = smov 32  }
  0x77   : > { %1381 = vmatprep.subr.bf16.mxu0 %v1526_v1  ;;  %1394 = vmatpush3.bf16.msra.mxu1 %v2054_v2  ;;  %v1530_v5 = vld [vmem:[#allocation2] sm:$0xff]   ;;  %v1531_v6 = vld [vmem:[#allocation2 + $0x8] sm:$0xff]   ;;  %v1532_v50 = vld [vmem:[#allocation2 + $0x10] sm:$0xff]   ;;  %vm532_vm2 = vcmask 257024   ;;  %s1336_s16 = sshll.u32 %s1856_s22, 7  ;;  %s1143_s14 = sshll.u32 %s2043_s17, 4  ;;  %s2226_s14 = int_to_ptr.vmem [resolvable:$true] %s1143_s14 }
  0x78   : > { %1382 = vmatpush3.bf16.msra.mxu0 %v1526_v1  ;;  %1395 = vmatprep.subr.bf16.mxu1 %v1797_v0  ;;  %v2082_v8 = vld [vmem:[%s281_s9] ss:$0 sm:$0xff]  ;;  %v1533_v51 = vld [vmem:[#allocation2 + $0x18] sm:$0xff]   ;;  %s1802_s9 = smov 96   ;;  %s2224_s11 = scalar_lea.hbm %s2317_s5, %s1336_s16 }
  0x79   : > { %1383 = vmatprep.subr.bf16.mxu0 %v1528_v3  ;;  %1385 = vmatprep.mubr.msk.bf16.mxu0 %vm358_vm1, %v1530_v5  ;;  %s1117_s7 = scalar_lea.sflag [#allocation12], %s1997_s10  ;;  %s1684_s25 = scalar_lea.vmem %s2226_s14, 128 }
  0x7a   : > { %p1685_p7 = scmp.ne.s32.totalorder %s2226_s14, %s1684_s25  ;;  %p2337_p8 = scmp.ne.s32.totalorder %s2325_s30, 0 }
  0x7b   : > { %1396 = vmatpush3.bf16.msra.mxu1 %v2059_v4  ;;  %s1803_s12 = smov [#allocation11]  }
  0x7c   : > { %1384 = vmatpush3.bf16.msra.mxu0 %v1528_v3  ;;  %1401 = vmatprep.subr.bf16.mxu1 %v1797_v0  ;;  %p1686_p4 = pnand %p1685_p7, %p2337_p8  ;;  %s1688_s23 = sshll.u32 %s1803_s12, 4  ;;  %s1689_s23 = int_to_ptr.vmem [resolvable:$false] %s1688_s23 }
  0x7d   : > { %1409 = vmatprep.subr.bf16.mxu0 %v1797_v0  ;;  %s1690_s15 = scalar_lea.vmem %s1689_s23, 256  ;;  %p1691_p12 = scmp.lt.s32.totalorder %s2226_s14, %s1689_s23 }
  0x7e   : > { %1398 = vmatmul.mubr.bf16.vlgmr.msra.gmra.mrb[0].mxu1 %v1799_v7  ;;  %p1687_p9 = pneg %p1686_p4  ;;  %p1692_p3 = scmp.lt.s32.totalorder %s1690_s15, %s1684_s25 }
  0x7f   : > { %1386 = vmatmul.mubr.msk.bf16.vlgmr.msra.gmra.mrb[0].mxu0 %vm358_vm1, %v1531_v6  ;;  %1402 = vmatpush3.bf16.msra.mxu1 %v2054_v2 }
  0x80   : > { %1405 = vmatprep.mubr.msk.bf16.mxu1 %vm1798_vm0, %v1797_v0  ;;  %1403 = vmatprep.subr.bf16.mxu1 %v1797_v0  ;;  %p1693_p0 = por %p1692_p3, %p1691_p12 }
  0x81   : > { %1410 = vmatpush3.bf16.msra.mxu0 %v2054_v2  ;;  %1389 = vmatprep.mubr.msk.bf16.mxu0 %vm358_vm1, %v1532_v50 }
  0x82   : > { %1411 = vmatprep.subr.bf16.mxu0 %v1797_v0  ;;  %p1694_p2 = pnand %p1693_p0, %p1687_p9 }
  0x83   : > { %1404 = vmatpush3.bf16.msra.mxu1 %v2059_v4 }
  0x84   : > { %1417 = vmatprep.subr.bf16.mxu1 %v1797_v0 }
  0x85   : > { %1412 = vmatpush3.bf16.msra.mxu0 %v2059_v4 }
  0x86   : > { %1425 = vmatprep.subr.bf16.mxu0 %v1797_v0 }
  0x87   : > { %1390 = vmatmul.mubr.msk.bf16.gmra.mrb[4].mxu0 %vm358_vm1, %v1533_v51 }
  0x88   : > { %1413 = vmatprep.mubr.msk.bf16.mxu0 %vm1798_vm0, %v1797_v0 }
 0x151   : > { %v494_v10 = vpop.f32.mrb[0].mxu1 }
 0x152   : > { %v2084_v9 = vpop.f32.mrb[0].mxu0  ;;  %v1399_v12 = vpop.f32.mrb[1].mxu1 }
 0x153   : > { %v405_v11 = vpop.f32.mrb[1].mxu0  ;;  %v497_v15 = vpop.f32.mrb[2].mxu1  ;;  %v414_v61 = vadd.f32 %v2084_v9, %v2082_v8 }
 0x154   : > { %v406_v13 = vadd.f32 %v2082_v8, %v405_v11  ;;  %v2087_v14 = vpop.f32.mrb[2].mxu0  ;;  %v1400_v17 = vpop.f32.mrb[3].mxu1 }
 0x155   : > { %v408_v16 = vpop.f32.mrb[3].mxu0 }
 0x156   : > { %v500_v18 = vadd.f32 %v494_v10, %v406_v13  ;;  %v409_v34 = vadd.f32 %v2082_v8, %v408_v16 }
 0x158   : > { %1534 = vtanh.f32 %v500_v18  ;;  %v1311_v20 = vmul.f32 -1.442695, %v500_v18 }
 0x15a   : > { %1536 = vpow2.f32 %v1311_v20  ;;  %v2115_v56 = vpop.f32.mrb[4].mxu0 }
 0x15b   : > { %v2117_v57 = vpop.f32.mrb[5].mxu0 }
 0x15c   : > { %v2119_v58 = vpop.f32.mrb[6].mxu0 }
 0x15d   : > { %v2121_v59 = vpop.f32.mrb[7].mxu0 }
 0x162   : > { %v1535_v19 = vpop.eup %1534 }
 0x163   : > { %510 = vrot.lane.b32.xlu0 %v1535_v19, %s1800_s28 }
 0x164   : > { %v1537_v21 = vpop.eup %1536 }
 0x165   : > { %v504_v22 = vadd.f32 1.0, %v1537_v21 }
 0x167   : > { %1538 = vrcp.f32 %v504_v22 }
 0x171   : > { %v1539_v23 = vpop.eup %1538 }
 0x172   : > { %v508_v26 = vmul.f32 0.0, %v1539_v23 }
 0x1d5   : > { %v511_v24 = vpop.permute.xlu0 %510 }
 0x1d6   : > { %v513_v25 = vmul.f32 %v1539_v23, %v511_v24 }
 0x1d8   : > { %515 = vrot.lane.b32.xlu0 %v513_v25, %s1801_s13 }
 0x24a   : > { %v516_v27 = vpop.permute.xlu0 %515 }
 0x24b   : > { %v518_v28 = vadd.f32 %v516_v27, %v508_v26 }
 0x24d   : > { %1540 = vtanh.f32 %v518_v28 }
 0x257   : > { %v1541_v29 = vpop.eup %1540 }
 0x258   : > { %521 = vrot.lane.b32.xlu1 %v1541_v29, %s1800_s28 }
 0x2ca   : > { %v522_v30 = vpop.permute.xlu1 %521 }
 0x2cb   : > { %v524_v31 = vmul.f32 %v1539_v23, %v522_v30  ;;  %v417_v23 = vadd.f32 %v2087_v14, %v2082_v8 }
 0x2cd   : > { %v2092_v32 = vpack.c.bf16 %v524_v31, %v524_v31 }
 0x2cf   : > { %536 = vrot.lane.b32.xlu1 %v2092_v32, %s1801_s13 }
 0x341   : > { %v537_v33 = vpop.permute.xlu1 %536 }
 0x342   : > { %1406 = vmatmul.mubr.msk.bf16.vlgmr.msra.gmra.mrb[4].mxu1 %vm358_vm1, %v537_v33 }
 0x343   : > { %1418 = vmatpush3.bf16.msra.mxu1 %v2054_v2  ;;  %1421 = vmatprep.mubr.msk.bf16.mxu1 %vm1798_vm0, %v1797_v0 }
 0x344   : > { %1419 = vmatprep.subr.bf16.mxu1 %v1797_v0 }
 0x347   : > { %1420 = vmatpush3.bf16.msra.mxu1 %v2059_v4 }
 0x348   : > { %1433 = vmatprep.subr.bf16.mxu1 %v1797_v0 }
 0x415   : > { %v575_v35 = vpop.f32.mrb[4].mxu1 }
 0x416   : > { %v581_v36 = vadd.f32 %v575_v35, %v409_v34  ;;  %v1407_v37 = vpop.f32.mrb[5].mxu1 }
 0x417   : > { %v578_v38 = vpop.f32.mrb[6].mxu1 }
 0x418   : > { %1542 = vtanh.f32 %v581_v36  ;;  %v1408_v39 = vpop.f32.mrb[7].mxu1  ;;  %v1314_v41 = vmul.f32 -1.442695, %v581_v36 }
 0x41a   : > { %1544 = vpow2.f32 %v1314_v41 }
 0x422   : > { %v1543_v40 = vpop.eup %1542 }
 0x423   : > { %591 = vrot.lane.b32.xlu0 %v1543_v40, %s1800_s28 }
 0x424   : > { %v1545_v42 = vpop.eup %1544 }
 0x425   : > { %v585_v43 = vadd.f32 1.0, %v1545_v42 }
 0x427   : > { %1546 = vrcp.f32 %v585_v43 }
 0x431   : > { %v1547_v44 = vpop.eup %1546 }
 0x432   : > { %v589_v47 = vmul.f32 %v1547_v44, %v518_v28 }
 0x495   : > { %v592_v45 = vpop.permute.xlu0 %591 }
 0x496   : > { %v594_v46 = vmul.f32 %v1547_v44, %v592_v45 }
 0x498   : > { %596 = vrot.lane.b32.xlu1 %v594_v46, %s1801_s13 }
 0x50a   : > { %v597_v48 = vpop.permute.xlu1 %596 }
 0x50b   : > { %v599_v49 = vadd.f32 %v597_v48, %v589_v47 }
 0x50d   : > { %1548 = vtanh.f32 %v599_v49 }
 0x517   : > { %v1549_v52 = vpop.eup %1548 }
 0x518   : > { %602 = vrot.lane.b32.xlu0 %v1549_v52, %s1800_s28 }
 0x58a   : > { %v603_v53 = vpop.permute.xlu0 %602 }
 0x58b   : > { %v605_v54 = vmul.f32 %v1547_v44, %v603_v53  ;;  %v422_v44 = vadd.f32 %v2082_v8, %v2117_v57 }
 0x58d   : > { %v2111_v55 = vpack.c.bf16 %v605_v54, %v605_v54 }
 0x58f   : > { %617 = vrot.lane.b32.xlu1 %v2111_v55, %s1801_s13 }
 0x601   : > { %v618_v60 = vpop.permute.xlu1 %617 }
 0x602   : > { %1414 = vmatmul.mubr.msk.bf16.vlgmr.msra.gmra.mrb[8].mxu0 %vm358_vm1, %v618_v60 }
 0x603   : > { %1426 = vmatpush3.bf16.msra.mxu0 %v2054_v2  ;;  %1429 = vmatprep.mubr.msk.bf16.mxu0 %vm1798_vm0, %v1797_v0 }
 0x604   : > { %1427 = vmatprep.subr.bf16.mxu0 %v1797_v0 }
 0x607   : > { %1428 = vmatpush3.bf16.msra.mxu0 %v2059_v4 }
 0x608   : > { %1441 = vmatprep.subr.bf16.mxu0 %v1797_v0 }
 0x6d5   : > { %v656_v62 = vpop.f32.mrb[8].mxu0 }
 0x6d6   : > { %v662_v63 = vadd.f32 %v656_v62, %v414_v61  ;;  %v1415_v1 = vpop.f32.mrb[9].mxu0 }
 0x6d7   : > { %v659_v3 = vpop.f32.mrb[10].mxu0 }
 0x6d8   : > { %1550 = vtanh.f32 %v662_v63  ;;  %v1416_v5 = vpop.f32.mrb[11].mxu0  ;;  %v1317_v7 = vmul.f32 -1.442695, %v662_v63 }
 0x6da   : > { %1552 = vpow2.f32 %v1317_v7 }
 0x6e2   : > { %v1551_v6 = vpop.eup %1550 }
 0x6e3   : > { %672 = vrot.lane.b32.xlu0 %v1551_v6, %s1800_s28 }
 0x6e4   : > { %v1553_v10 = vpop.eup %1552 }
 0x6e5   : > { %v666_v11 = vadd.f32 1.0, %v1553_v10  ;;  %v425_v10 = vadd.f32 %v2082_v8, %v2121_v59 }
 0x6e7   : > { %1554 = vrcp.f32 %v666_v11 }
 0x6f1   : > { %v1555_v12 = vpop.eup %1554 }
 0x6f2   : > { %v670_v9 = vmul.f32 %v1555_v12, %v599_v49 }
 0x755   : > { %v673_v13 = vpop.permute.xlu0 %672 }
 0x756   : > { %v675_v15 = vmul.f32 %v1555_v12, %v673_v13 }
 0x758   : > { %677 = vrot.lane.b32.xlu1 %v675_v15, %s1801_s13 }
 0x7ca   : > { %v678_v16 = vpop.permute.xlu1 %677 }
 0x7cb   : > { %v680_v17 = vadd.f32 %v678_v16, %v670_v9 }
 0x7cd   : > { %1556 = vtanh.f32 %v680_v17 }
 0x7d7   : > { %v1557_v18 = vpop.eup %1556 }
 0x7d8   : > { %683 = vrot.lane.b32.xlu0 %v1557_v18, %s1800_s28 }
 0x84a   : > { %v684_v19 = vpop.permute.xlu0 %683 }
 0x84b   : > { %v686_v20 = vmul.f32 %v1555_v12, %v684_v19 }
 0x84d   : > { %v2135_v21 = vpack.c.bf16 %v686_v20, %v686_v20 }
 0x84f   : > { %698 = vrot.lane.b32.xlu1 %v2135_v21, %s1801_s13 }
 0x8c1   : > { %v699_v22 = vpop.permute.xlu1 %698 }
 0x8c2   : > { %1422 = vmatmul.mubr.msk.bf16.vlgmr.msra.gmra.mrb[8].mxu1 %vm358_vm1, %v699_v22 }
 0x8c3   : > { %1434 = vmatpush3.bf16.msra.mxu1 %v2054_v2  ;;  %1437 = vmatprep.mubr.msk.bf16.mxu1 %vm1798_vm0, %v1797_v0 }
 0x8c4   : > { %1435 = vmatprep.subr.bf16.mxu1 %v1797_v0 }
 0x8c7   : > { %1436 = vmatpush3.bf16.msra.mxu1 %v2059_v4 }
 0x8c8   : > { %1449 = vmatprep.subr.bf16.mxu1 %v1797_v0 }
 0x995   : > { %v737_v24 = vpop.f32.mrb[8].mxu1 }
 0x996   : > { %v743_v25 = vadd.f32 %v737_v24, %v417_v23  ;;  %v1423_v26 = vpop.f32.mrb[9].mxu1 }
 0x997   : > { %v740_v27 = vpop.f32.mrb[10].mxu1 }
 0x998   : > { %1558 = vtanh.f32 %v743_v25  ;;  %v1424_v28 = vpop.f32.mrb[11].mxu1  ;;  %v1320_v30 = vmul.f32 -1.442695, %v743_v25 }
 0x999   : > { %v430_v28 = vadd.f32 %v2115_v56, %v2082_v8 }
 0x99a   : > { %1560 = vpow2.f32 %v1320_v30 }
 0x9a2   : > { %v1559_v29 = vpop.eup %1558 }
 0x9a3   : > { %753 = vrot.lane.b32.xlu0 %v1559_v29, %s1800_s28 }
 0x9a4   : > { %v1561_v31 = vpop.eup %1560 }
 0x9a5   : > { %v747_v33 = vadd.f32 1.0, %v1561_v31 }
 0x9a7   : > { %1562 = vrcp.f32 %v747_v33 }
 0x9b1   : > { %v1563_v34 = vpop.eup %1562 }
 0x9b2   : > { %v751_v14 = vmul.f32 %v1563_v34, %v680_v17 }
 0xa15   : > { %v754_v35 = vpop.permute.xlu0 %753 }
 0xa16   : > { %v756_v36 = vmul.f32 %v1563_v34, %v754_v35 }
 0xa18   : > { %758 = vrot.lane.b32.xlu1 %v756_v36, %s1801_s13 }
 0xa8a   : > { %v759_v37 = vpop.permute.xlu1 %758 }
 0xa8b   : > { %v761_v38 = vadd.f32 %v759_v37, %v751_v14 }
 0xa8d   : > { %1564 = vtanh.f32 %v761_v38 }
 0xa97   : > { %v1565_v39 = vpop.eup %1564 }
 0xa98   : > { %764 = vrot.lane.b32.xlu0 %v1565_v39, %s1800_s28 }
 0xb0a   : > { %v765_v40 = vpop.permute.xlu0 %764 }
 0xb0b   : > { %v767_v41 = vmul.f32 %v1563_v34, %v765_v40 }
 0xb0d   : > { %v2151_v42 = vpack.c.bf16 %v767_v41, %v767_v41 }
 0xb0f   : > { %779 = vrot.lane.b32.xlu1 %v2151_v42, %s1801_s13 }
 0xb81   : > { %v780_v43 = vpop.permute.xlu1 %779 }
 0xb82   : > { %1430 = vmatmul.mubr.msk.bf16.vlgmr.msra.gmra.mrb[12].mxu0 %vm358_vm1, %v780_v43 }
 0xb83   : > { %1442 = vmatpush3.bf16.msra.mxu0 %v2054_v2  ;;  %1445 = vmatprep.mubr.msk.bf16.mxu0 %vm1798_vm0, %v1797_v0 }
 0xb84   : > { %1443 = vmatprep.subr.bf16.mxu0 %v1797_v0 }
 0xb87   : > { %1444 = vmatpush3.bf16.msra.mxu0 %v2059_v4 }
 0xc55   : > { %v818_v45 = vpop.f32.mrb[12].mxu0 }
 0xc56   : > { %v824_v46 = vadd.f32 %v818_v45, %v422_v44  ;;  %v1431_v47 = vpop.f32.mrb[13].mxu0 }
 0xc57   : > { %v821_v48 = vpop.f32.mrb[14].mxu0 }
 0xc58   : > { %1566 = vtanh.f32 %v824_v46  ;;  %v1432_v49 = vpop.f32.mrb[15].mxu0  ;;  %v1323_v51 = vmul.f32 -1.442695, %v824_v46 }
 0xc59   : > { %v433_v49 = vadd.f32 %v2119_v58, %v2082_v8 }
 0xc5a   : > { %1568 = vpow2.f32 %v1323_v51 }
 0xc62   : > { %v1567_v50 = vpop.eup %1566 }
 0xc63   : > { %834 = vrot.lane.b32.xlu0 %v1567_v50, %s1800_s28 }
 0xc64   : > { %v1569_v52 = vpop.eup %1568 }
 0xc65   : > { %v828_v53 = vadd.f32 1.0, %v1569_v52 }
 0xc67   : > { %1570 = vrcp.f32 %v828_v53 }
 0xc71   : > { %v1571_v54 = vpop.eup %1570 }
 0xc72   : > { %v832_v57 = vmul.f32 %v1571_v54, %v761_v38 }
 0xcd5   : > { %v835_v60 = vpop.permute.xlu0 %834 }
 0xcd6   : > { %v837_v61 = vmul.f32 %v1571_v54, %v835_v60 }
 0xcd8   : > { %839 = vrot.lane.b32.xlu1 %v837_v61, %s1801_s13 }
 0xd4a   : > { %v840_v62 = vpop.permute.xlu1 %839 }
 0xd4b   : > { %v842_v63 = vadd.f32 %v840_v62, %v832_v57 }
 0xd4d   : > { %1572 = vtanh.f32 %v842_v63 }
 0xd57   : > { %v1573_v1 = vpop.eup %1572 }
 0xd58   : > { %845 = vrot.lane.b32.xlu0 %v1573_v1, %s1800_s28 }
 0xdca   : > { %v846_v3 = vpop.permute.xlu0 %845 }
 0xdcb   : > { %v848_v5 = vmul.f32 %v1571_v54, %v846_v3 }
 0xdcd   : > { %v2166_v6 = vpack.c.bf16 %v848_v5, %v848_v5 }
 0xdcf   : > { %860 = vrot.lane.b32.xlu1 %v2166_v6, %s1801_s13 }
 0xe41   : > { %v861_v7 = vpop.permute.xlu1 %860 }
 0xe42   : > { %1438 = vmatmul.mubr.msk.bf16.vlgmr.msra.gmra.mrb[12].mxu1 %vm358_vm1, %v861_v7 }
 0xe43   : > { %1450 = vmatpush3.bf16.msra.mxu1 %v2054_v2  ;;  %1453 = vmatprep.mubr.msk.bf16.mxu1 %vm1798_vm0, %v1797_v0 }
 0xe44   : > { %1451 = vmatprep.subr.bf16.mxu1 %v1797_v0 }
 0xe47   : > { %1452 = vmatpush3.bf16.msra.mxu1 %v2059_v4 }
 0xf15   : > { %v899_v11 = vpop.f32.mrb[12].mxu1 }
 0xf16   : > { %v905_v12 = vadd.f32 %v899_v11, %v425_v10  ;;  %v1439_v13 = vpop.f32.mrb[13].mxu1 }
 0xf17   : > { %v902_v15 = vpop.f32.mrb[14].mxu1 }
 0xf18   : > { %1574 = vtanh.f32 %v905_v12  ;;  %v1440_v9 = vpop.f32.mrb[15].mxu1  ;;  %v1326_v2 = vmul.f32 -1.442695, %v905_v12 }
 0xf1a   : > { %1576 = vpow2.f32 %v1326_v2 }
 0xf22   : > { %v1575_v16 = vpop.eup %1574 }
 0xf23   : > { %915 = vrot.lane.b32.xlu0 %v1575_v16, %s1800_s28 }
 0xf24   : > { %v1577_v17 = vpop.eup %1576 }
 0xf25   : > { %v909_v18 = vadd.f32 1.0, %v1577_v17 }
 0xf27   : > { %1578 = vrcp.f32 %v909_v18 }
 0xf31   : > { %v1579_v0 = vpop.eup %1578 }
 0xf32   : > { %v913_v59 = vmul.f32 %v1579_v0, %v842_v63 }
 0xf95   : > { %v916_v19 = vpop.permute.xlu0 %915 }
 0xf96   : > { %v918_v4 = vmul.f32 %v1579_v0, %v916_v19 }
 0xf98   : > { %920 = vrot.lane.b32.xlu1 %v918_v4, %s1801_s13 }
0x100a   : > { %v921_v20 = vpop.permute.xlu1 %920 }
0x100b   : > { %v923_v22 = vadd.f32 %v921_v20, %v913_v59 }
0x100d   : > { %1580 = vtanh.f32 %v923_v22 }
0x1017   : > { %v1581_v23 = vpop.eup %1580 }
0x1018   : > { %926 = vrot.lane.b32.xlu0 %v1581_v23, %s1800_s28 }
0x108a   : > { %v927_v24 = vpop.permute.xlu0 %926 }
0x108b   : > { %v929_v25 = vmul.f32 %v1579_v0, %v927_v24 }
0x108d   : > { %v2181_v26 = vpack.c.bf16 %v929_v25, %v929_v25 }
0x108f   : > { %941 = vrot.lane.b32.xlu1 %v2181_v26, %s1801_s13 }
0x1101   : > { %v942_v27 = vpop.permute.xlu1 %941 }
0x1102   : > { %1446 = vmatmul.mubr.msk.bf16.vlgmr.msra.gmra.mrb[16].mxu0 %vm358_vm1, %v942_v27 }
0x11d5   : > { %v980_v29 = vpop.f32.mrb[16].mxu0 }
0x11d6   : > { %v986_v30 = vadd.f32 %v980_v29, %v430_v28  ;;  %v1447_v31 = vpop.f32.mrb[17].mxu0 }
0x11d7   : > { %v983_v33 = vpop.f32.mrb[18].mxu0 }
0x11d8   : > { %1582 = vtanh.f32 %v986_v30  ;;  %v1448_v34 = vpop.f32.mrb[19].mxu0  ;;  %v1329_v36 = vmul.f32 -1.442695, %v986_v30 }
0x11da   : > { %1584 = vpow2.f32 %v1329_v36 }
0x11e2   : > { %v1583_v35 = vpop.eup %1582 }
0x11e3   : > { %996 = vrot.lane.b32.xlu0 %v1583_v35, %s1800_s28 }
0x11e4   : > { %v1585_v14 = vpop.eup %1584 }
0x11e5   : > { %v990_v37 = vadd.f32 1.0, %v1585_v14 }
0x11e7   : > { %1586 = vrcp.f32 %v990_v37 }
0x11f1   : > { %v1587_v38 = vpop.eup %1586 }
0x11f2   : > { %v994_v56 = vmul.f32 %v1587_v38, %v923_v22 }
0x1255   : > { %v997_v39 = vpop.permute.xlu0 %996 }
0x1256   : > { %v999_v40 = vmul.f32 %v1587_v38, %v997_v39 }
0x1258   : > { %1001 = vrot.lane.b32.xlu1 %v999_v40, %s1801_s13 }
0x12ca   : > { %v1002_v41 = vpop.permute.xlu1 %1001 }
0x12cb   : > { %v1004_v43 = vadd.f32 %v1002_v41, %v994_v56 }
0x12cd   : > { %1588 = vtanh.f32 %v1004_v43 }
0x12d7   : > { %v1589_v44 = vpop.eup %1588 }
0x12d8   : > { %1007 = vrot.lane.b32.xlu0 %v1589_v44, %s1800_s28 }
0x134a   : > { %v1008_v45 = vpop.permute.xlu0 %1007 }
0x134b   : > { %v1010_v46 = vmul.f32 %v1587_v38, %v1008_v45 }
0x134d   : > { %v2191_v47 = vpack.c.bf16 %v1010_v46, %v1010_v46 }
0x134f   : > { %1022 = vrot.lane.b32.xlu1 %v2191_v47, %s1801_s13 }
0x13c1   : > { %v1023_v48 = vpop.permute.xlu1 %1022 }
0x13c2   : > { %1454 = vmatmul.mubr.msk.bf16.vlgmr.msra.gmra.mrb[16].mxu1 %vm358_vm1, %v1023_v48 }
0x1495   : > { %v1061_v50 = vpop.f32.mrb[16].mxu1 }
0x1496   : > { %v1067_v51 = vadd.f32 %v1061_v50, %v433_v49  ;;  %v1455_v52 = vpop.f32.mrb[17].mxu1 }
0x1497   : > { %v1064_v53 = vpop.f32.mrb[18].mxu1 }
0x1498   : > { %1590 = vtanh.f32 %v1067_v51  ;;  %v1456_v54 = vpop.f32.mrb[19].mxu1  ;;  %v1332_v61 = vmul.f32 -1.442695, %v1067_v51 }
0x149a   : > { %1592 = vpow2.f32 %v1332_v61 }
0x14a2   : > { %v1591_v60 = vpop.eup %1590 }
0x14a3   : > { %1077 = vrot.lane.b32.xlu0 %v1591_v60, %s1800_s28 }
0x14a4   : > { %v1593_v57 = vpop.eup %1592 }
0x14a5   : > { %v1071_v62 = vadd.f32 1.0, %v1593_v57 }
0x14a7   : > { %1594 = vrcp.f32 %v1071_v62 }
0x14b1   : > { %v1595_v63 = vpop.eup %1594 }
0x14b2   : > { %v1075_v8 = vmul.f32 %v1595_v63, %v1004_v43 }
0x1515   : > { %v1078_v1 = vpop.permute.xlu0 %1077 }
0x1516   : > { %v1080_v3 = vmul.f32 %v1595_v63, %v1078_v1 }
0x1518   : > { %1082 = vrot.lane.b32.xlu1 %v1080_v3, %s1801_s13 }
0x151c   : > { %529 = vrot.lane.b32.xlu1 %v2092_v32, %s1801_s13 }
0x1520   : > { %691 = vrot.lane.b32.xlu1 %v2135_v21, %s1801_s13 }
0x1524   : > { %853 = vrot.lane.b32.xlu1 %v2166_v6, %s1801_s13 }
0x158a   : > { %v1083_v58 = vpop.permute.xlu1 %1082 }
0x158b   : > { %v1085_v5 = vadd.f32 %v1083_v58, %v1075_v8 }
0x158d   : > { %1596 = vtanh.f32 %v1085_v5 }
0x158e   : > { %v530_v7 = vpop.permute.xlu1 %529 }
0x158f   : > { %533 = vst.msk [vmem:[#allocation2] sm:$0xf] %vm532_vm2, %v530_v7 }
0x1592   : > { %v692_v10 = vpop.permute.xlu1 %691 }
0x1593   : > { %695 = vst.msk [vmem:[#allocation2 + $0x8] sm:$0xf] %vm532_vm2, %v692_v10 }
0x1596   : > { %v854_v32 = vpop.permute.xlu1 %853 }
0x1597   : > { %v1597_v11 = vpop.eup %1596  ;;  %857 = vst.msk [vmem:[#allocation2 + $0x10] sm:$0xf] %vm532_vm2, %v854_v32 }
0x1598   : > { %1088 = vrot.lane.b32.xlu0 %v1597_v11, %s1800_s28 }
0x159c   : > { %1107 = vrot.lane.b32.xlu0 %v1085_v5, %s1802_s9 }
0x15a0   : > { %610 = vrot.lane.b32.xlu0 %v2111_v55, %s1801_s13 }
0x15a4   : > { %772 = vrot.lane.b32.xlu0 %v2151_v42, %s1801_s13 }
0x15a8   : > { %934 = vrot.lane.b32.xlu0 %v2181_v26, %s1801_s13 }
0x160a   : > { %v1089_v21 = vpop.permute.xlu0 %1088 }
0x160b   : > { %v1091_v6 = vmul.f32 %v1595_v63, %v1089_v21 }
0x160d   : > { %v1350_v12 = vpack.c.bf16 %v1091_v6, %v1091_v6  ;;  %1102 = vrot.lane.b32.xlu1 %v1091_v6, %s1801_s13 }
0x160e   : > { %v1108_v55 = vpop.permute.xlu0 %1107 }
0x160f   : > { %1110 = vst.msk [vmem:[%s2043_s17] sm:$0xff] %vm358_vm1, %v1108_v55  ;;  %1096 = vrot.lane.b32.xlu0 %v1350_v12, %s1801_s13 }
0x1610   : > { %1697 = shalt.err (!%p1694_p2)
}
0x1611   : > { %s1698_s17 = scalar_lea.hbm %s2224_s11, 128  ;;  %s1702_s9 = scalar_lea.hbm %s2317_s5, 256 }
0x1612   : > { %p1699_p5 = scmp.ne.s32.totalorder %s2224_s11, %s1698_s17  ;;  %p1703_p1 = scmp.lt.u32.totalorder %s2224_s11, %s2317_s5 }
0x1613   : > { %p1704_p11 = scmp.lt.u32.totalorder %s1702_s9, %s1698_s17  ;;  %p1706_p7 = scmp.lt.u32.totalorder %s1698_s17, %s2224_s11 }
0x1614   : > { %p1700_p6 = pnand %p1699_p5, %p2337_p8 }
0x1615   : > { %p1705_p10 = por %p1704_p11, %p1703_p1 }
0x1616   : > { %p1701_p13 = pneg %p1700_p6 }
0x1617   : > { %p1707_p4 = por %p1706_p7, %p1705_p10 }
0x1619   : > { %p1708_p9 = pnand %p1707_p4, %p1701_p13 }
0x161b   : > { %1711 = shalt.err (!%p1708_p9)
}
0x161c   : > { %1465 = dma.vmem_to_hbm [thread:$0]  (%p2337_p8), %s2226_s14, 128, %s2224_s11, %s1117_s7   ;;  %1015 = vrot.lane.b32.xlu1 %v2191_v47, %s1801_s13  ;;  %v611_v42 = vpop.permute.xlu0 %610 }
0x161d   : > { %614 = vst.msk [vmem:[#allocation2 + $0x4] sm:$0xf] %vm532_vm2, %v611_v42  ;;  %s1130_s25 = sshll.u32 %s2041_s1, 4  ;;  %s2264_s15 = scalar_lea.hbm %s2316_s4, %s1336_s16  ;;  %s2266_s25 = int_to_ptr.vmem [resolvable:$true] %s1130_s25 }
0x161e   : > { %s1112_s13 = scalar_lea.sflag [#allocation7], %s1997_s10  ;;  %s1712_s14 = scalar_lea.vmem %s2266_s25, 128 }
0x161f   : > { %p1713_p12 = scmp.ne.s32.totalorder %s2266_s25, %s1712_s14  ;;  %s1804_s22 = smov [#allocation10]  }
0x1620   : > { %v773_v13 = vpop.permute.xlu0 %772  ;;  %s1716_s11 = sshll.u32 %s1804_s22, 4  ;;  %s1717_s11 = int_to_ptr.vmem [resolvable:$false] %s1716_s11 }
0x1621   : > { %776 = vst.msk [vmem:[#allocation2 + $0xc] sm:$0xf] %vm532_vm2, %v773_v13  ;;  %p1714_p3 = pnand %p1713_p12, %p2337_p8  ;;  %s1718_s16 = scalar_lea.vmem %s1717_s11, 256 }
0x1622   : > { %p1719_p2 = scmp.lt.s32.totalorder %s2266_s25, %s1717_s11  ;;  %p1720_p5 = scmp.lt.s32.totalorder %s1718_s16, %s1712_s14 }
0x1623   : > { %p1715_p0 = pneg %p1714_p3 }
0x1624   : > { %v935_v15 = vpop.permute.xlu0 %934  ;;  %p1721_p6 = por %p1720_p5, %p1719_p2 }
0x1625   : > { %938 = vst.msk [vmem:[#allocation2 + $0x14] sm:$0xf] %vm532_vm2, %v935_v15 }
0x1626   : > { %p1722_p13 = pnand %p1721_p6, %p1715_p0 }
0x167f   : > { %v1103_v9 = vpop.permute.xlu1 %1102 }
0x1680   : > { %1105 = vst.msk [vmem:[%s2041_s1] sm:$0xff] %vm358_vm1, %v1103_v9 }
0x1681   : > { %v1097_v16 = vpop.permute.xlu0 %1096 }
0x1682   : > { %1725 = shalt.err (!%p1722_p13)
}
0x1683   : > { %s1726_s10 = scalar_lea.hbm %s2264_s15, 128  ;;  %s1730_s17 = scalar_lea.hbm %s2316_s4, 256 }
0x1684   : > { %p1727_p1 = scmp.ne.s32.totalorder %s2264_s15, %s1726_s10  ;;  %p1731_p7 = scmp.lt.u32.totalorder %s2264_s15, %s2316_s4 }
0x1685   : > { %p1732_p4 = scmp.lt.u32.totalorder %s1730_s17, %s1726_s10  ;;  %p1734_p12 = scmp.lt.u32.totalorder %s1726_s10, %s2264_s15 }
0x1686   : > { %p1728_p11 = pnand %p1727_p1, %p2337_p8 }
0x1687   : > { %p1733_p9 = por %p1732_p4, %p1731_p7 }
0x1688   : > { %p1729_p10 = pneg %p1728_p11 }
0x1689   : > { %p1735_p3 = por %p1734_p12, %p1733_p9 }
0x168b   : > { %p1736_p0 = pnand %p1735_p3, %p1729_p10 }
0x168d   : > { %1739 = shalt.err (!%p1736_p0)
}
0x168e   : > { %1464 = dma.vmem_to_hbm [thread:$0]  (%p2337_p8), %s2266_s25, 128, %s2264_s15, %s1112_s13   ;;  %1100 = vst.msk [vmem:[#allocation2 + $0x1c] sm:$0xf] %vm532_vm2, %v1097_v16  ;;  %v1016_v2 = vpop.permute.xlu1 %1015 }
0x168f   : > { %1019 = vst.msk [vmem:[#allocation2 + $0x18] sm:$0xf] %vm532_vm2, %v1016_v2 }
0x1690 PF: > { %s1155_s9 = sand.u32 1, %s1778_s18   ;;  %p2338_p2 = scmp.ne.s32.totalorder %s2326_s6, 0 }
0x1691   : > { %p2339_p5 = scmp.ge.s32.totalorder %s1790_s21, 2  ;;  %s1156_s29 = scalar_lea.sflag [#allocation7], %s1155_s9 }
0x1693   : > { %p1476_p6 = pnand %p2339_p5, %p2338_p2 }
0x1695   : > { %1769 = dma.done.wait (!%p1476_p6), %s1156_s29, 128  }
0x1696   : > { %1771 = vsyncadd (!%p1476_p6), %s1156_s29, 4294967168  ;;  %s1165_s30 = scalar_lea.sflag [#allocation12], %s1155_s9 }
0x1697   : > { %1773 = dma.done.wait (!%p1476_p6), %s1165_s30, 128  }
0x1698   : > { %1775 = vsyncadd (!%p1476_p6), %s1165_s30, 4294967168  ;;  %p25_p8 = scmp.ge.s32.totalorder %s1860_s24, 4   ;;  %s2340_s18 = smov %s1782_s19 }
0x1699   : > { %s2341_s19 = smov %s1786_s20  ;;  %s2342_s20 = smov %s1872_s27 }
0x169a   : > { %s2343_s21 = smov %s1860_s24  ;;  %27 = sbr.rel (!%p25_p8) target bundleno = 11 (0xb), region = 132 }
0x16a1   :  { %1170 = vsyncpa [#allocation6], 1 }
0x16a2   :  { %1172 = vsyncpa [#allocation6 + $0x1], 1 }
0x16a3   :  { %1173 = vsyncpa [#allocation9], 1 }
0x16a4   :  { %1175 = vsyncpa [#allocation9 + $0x1], 1 }
0x16a5   :  { %1176 = vsyncpa [#allocation7], 1 }
0x16a6   :  { %1178 = vsyncpa [#allocation7 + $0x1], 1 }
0x16a7   :  { %1179 = vsyncpa [#allocation12], 1 }
0x16a8   :  { %1181 = vsyncpa [#allocation12 + $0x1], 1 }
0x16a9   :  { %1182 = vsyncmov [#allocation4] }
0x16ac   :  { %s1183_s21 = vpop.sfrf %1182 }
0x16ad   :  { %p1340_p13 = scmp.ne.s32.totalorder %s1183_s21, 0 }
0x16af   :  { %1187 = shalt.err (%p1340_p13)  }

</bundles_post_ra>
